<compile_context>
chip_gen: v7x
topology: tpu7x:2x2x1
jax: 0.10.0
libtpu: 0.0.40
codegen_flags: <defaults>
</compile_context>

<pallas_src>
import math
import functools

import jax
import jax.numpy as jnp
from jax.experimental import pallas as pl
from jax.experimental.pallas import tpu as pltpu

D_MODEL = 32
NHEAD = 4
HEAD_DIM = D_MODEL // NHEAD
LN_EPS = 1e-5


def _self_attn_layer_kernel(tgt_ref, pos_ref,
                            wq_ref, wk_ref, wv_ref,
                            bq_ref, bk_ref, bv_ref,
                            wo_ref, bo_ref,
                            gamma_ref, beta_ref,
                            out_ref):
    # One batch chunk per grid step, PyTorch layout: tiles are (L, Bc, E).
    L, Bc, E = tgt_ref.shape
    M = L * Bc

    # Cast to f32 right after load (bf16 I/O path stays storage-only on v5e).
    x = tgt_ref[...].astype(jnp.float32).reshape(M, E)          # rows ordered (l, b)
    qk_in = x + pos_ref[...].astype(jnp.float32).reshape(M, E)  # with_pos_embed

    # Projections.  The 1/sqrt(head_dim) scale is pre-folded into wq/bq.
    q = jnp.dot(qk_in, wq_ref[...], preferred_element_type=jnp.float32) + bq_ref[...]
    k = jnp.dot(qk_in, wk_ref[...], preferred_element_type=jnp.float32) + bk_ref[...]
    v = jnp.dot(x,     wv_ref[...], preferred_element_type=jnp.float32) + bv_ref[...]

    # (M, E) -> (Bc*NHEAD, L, HEAD_DIM): heads merged into the batch axis so the
    # two attention matmuls are single-batch-dim einsums.  One relayout per
    # tensor (vs 12 width-8 lane slices in the per-head-loop version).
    def to_heads(t):
        t4 = t.reshape(L, Bc, NHEAD, HEAD_DIM)
        return jnp.transpose(t4, (1, 2, 0, 3)).reshape(Bc * NHEAD, L, HEAD_DIM)

    qh = to_heads(q)
    kh = to_heads(k)
    vh = to_heads(v)

    s = jnp.einsum('bld,bmd->blm', qh, kh,
                   preferred_element_type=jnp.float32)           # (Bc*H, L, L)
    s = s - jnp.max(s, axis=-1, keepdims=True)
    p = jnp.exp(s)
    p = p / jnp.sum(p, axis=-1, keepdims=True)                   # exact normalization
    o = jnp.einsum('blm,bmd->bld', p, vh,
                   preferred_element_type=jnp.float32)           # (Bc*H, L, HEAD_DIM)

    # Back to (l, b)-row / head-major-lane layout, then ONE K=E output projection.
    o = o.reshape(Bc, NHEAD, L, HEAD_DIM)
    o = jnp.transpose(o, (2, 0, 1, 3)).reshape(M, E)
    attn = jnp.dot(o, wo_ref[...], preferred_element_type=jnp.float32) + bo_ref[...]

    # Residual (dropout is identity at p=0.0) + LayerNorm over the last dim.
    r = x + attn
    mean = jnp.mean(r, axis=-1, keepdims=True)
    var = jnp.mean((r - mean) ** 2, axis=-1, keepdims=True)
    y = (r - mean) * jax.lax.rsqrt(var + LN_EPS)
    y = y * gamma_ref[...] + beta_ref[...]

    out_ref[...] = y.reshape(L, Bc, E).astype(out_ref.dtype)


def prepare_params(params):
    """One-time parameter preparation (outside jit): fold the attention scale
    1/sqrt(head_dim) into the Q projection weights and bias."""
    scale = 1.0 / math.sqrt(HEAD_DIM)
    out = dict(params)
    out["wq"] = params["wq"] * scale
    out["bq"] = params["bq"] * scale
    return out


def _vmem_limit_bytes(L, Bc, E, io_itemsize):
    # Double-buffered I/O chunks + weights + f32 intermediates (q/k/v/heads and
    # the per-head (L, L) score/prob tensors), with 2x headroom.  Clamped to
    # [32 MiB, 64 MiB]: raises v5e's 16 MiB scoped default, fits v7x's 64 MiB.
    chunk = L * Bc * E * io_itemsize
    weights = (4 * E * E + 6 * E) * 4
    interm = 8 * L * Bc * E * 4 + 2 * Bc * NHEAD * L * L * 4
    need = 3 * 2 * chunk + 2 * weights + interm
    return int(min(max(2 * need, 32 << 20), 64 << 20))


@functools.partial(jax.jit, static_argnames=("batch_chunks", "core_parallel"))
def self_attention_layer(tgt, query_pos, params, *, batch_chunks=1, core_parallel=False):
    """SelfAttentionLayer.forward_post.

    tgt / query_pos: (L, N, E) (native PyTorch layout — no wrapper transposes).
    params: output of prepare_params(...).
    batch_chunks: grid steps over the batch axis; the per-step chunk Bc must be
      the full batch or a multiple of 8 (sublane rule).  Use >1 at production
      sizes so BlockSpec double-buffering overlaps DMA with compute.
    core_parallel: mark the batch-chunk axis CORE_PARALLEL (v7x, 2 TensorCores).
    """
    L, N, E = tgt.shape
    assert E == NHEAD * HEAD_DIM == D_MODEL
    assert N % batch_chunks == 0, "batch must divide evenly into chunks"
    Bc = N // batch_chunks
    assert Bc == N or Bc % 8 == 0, "chunk (sublane dim) must be full batch or a multiple of 8"

    chunk_spec = pl.BlockSpec((L, Bc, E), lambda c: (0, c, 0))
    w_spec = pl.BlockSpec((E, E), lambda c: (0, 0))
    b_spec = pl.BlockSpec((1, E), lambda c: (0, 0))

    semantics = (pltpu.CORE_PARALLEL,) if core_parallel else ("parallel",)

    return pl.pallas_call(
        _self_attn_layer_kernel,
        out_shape=jax.ShapeDtypeStruct((L, N, E), tgt.dtype),
        grid_spec=pltpu.PrefetchScalarGridSpec(
            num_scalar_prefetch=0,
            grid=(batch_chunks,),
            in_specs=[chunk_spec, chunk_spec,
                      w_spec, w_spec, w_spec,
                      b_spec, b_spec, b_spec,
                      w_spec, b_spec,
                      b_spec, b_spec],
            out_specs=chunk_spec,
        ),
        compiler_params=pltpu.CompilerParams(
            dimension_semantics=semantics,
            vmem_limit_bytes=_vmem_limit_bytes(L, Bc, E, tgt.dtype.itemsize)),
    )(tgt, query_pos,
      params["wq"], params["wk"], params["wv"],
      params["bq"], params["bk"], params["bv"],
      params["wo"], params["bo"],
      params["gamma"], params["beta"])


def _reference(tgt, pos, params):
    """Pure-JAX forward_post reference on (L, N, E), with the un-folded scale."""
    L, N, E = tgt.shape
    qk_in = tgt + pos
    q = qk_in @ params["wq"] + params["bq"]
    k = qk_in @ params["wk"] + params["bk"]
    v = tgt @ params["wv"] + params["bv"]
    qh = q.reshape(L, N, NHEAD, HEAD_DIM)
    kh = k.reshape(L, N, NHEAD, HEAD_DIM)
    vh = v.reshape(L, N, NHEAD, HEAD_DIM)
    s = jnp.einsum("lnhd,mnhd->nhlm", qh, kh) / math.sqrt(HEAD_DIM)
    a = jax.nn.softmax(s, axis=-1)
    o = jnp.einsum("nhlm,mnhd->lnhd", a, vh).reshape(L, N, E)
    o = o @ params["wo"] + params["bo"]
    r = tgt + o
    mean = jnp.mean(r, axis=-1, keepdims=True)
    var = jnp.mean((r - mean) ** 2, axis=-1, keepdims=True)
    y = (r - mean) / jnp.sqrt(var + LN_EPS)
    return y * params["gamma"] + params["beta"]


def _xavier_uniform(key, shape):
    fan_in, fan_out = shape[0], shape[1]
    limit = math.sqrt(6.0 / (fan_in + fan_out))
    return jax.random.uniform(key, shape, jnp.float32, -limit, limit)


def make_params(key, d_model):
    ks = jax.random.split(key, 8)
    return {
        # Right-multiply projection matrices (equivalent to PyTorch W^T).
        "wq": _xavier_uniform(ks[0], (d_model, d_model)),
        "wk": _xavier_uniform(ks[1], (d_model, d_model)),
        "wv": _xavier_uniform(ks[2], (d_model, d_model)),
        "wo": _xavier_uniform(ks[3], (d_model, d_model)),
        # PyTorch zero-inits these biases; use small nonzero values to
        # exercise the bias adds.
        "bq": 0.01 * jax.random.normal(ks[4], (1, d_model), jnp.float32),
        "bk": 0.01 * jax.random.normal(ks[5], (1, d_model), jnp.float32),
        "bv": 0.01 * jax.random.normal(ks[6], (1, d_model), jnp.float32),
        "bo": 0.01 * jax.random.normal(ks[7], (1, d_model), jnp.float32),
        # LayerNorm affine params (untouched by _reset_parameters).
        "gamma": jnp.ones((1, d_model), jnp.float32),
        "beta": jnp.zeros((1, d_model), jnp.float32),
    }
# TODO(synk): attn_mask / key_padding_mask (None in this forward path) and
# dropout > 0 are not implemented.


if __name__ == "__main__":
    key = jax.random.PRNGKey(0)
    k_tgt, k_pos, k_par, k_tgt2, k_pos2 = jax.random.split(key, 5)

    E = D_MODEL
    params = make_params(k_par, E)
    prepared = prepare_params(params)   # one-time prep (scale folding), outside jit

    # Test 1: module-sized shapes (L=8, N=2), whole batch in one grid step.
    L, N = 8, 2
    tgt = jax.random.normal(k_tgt, (L, N, E), jnp.float32)
    query_pos = jax.random.normal(k_pos, (L, N, E), jnp.float32)
    ref = _reference(tgt, query_pos, params)
    out = self_attention_layer(tgt, query_pos, prepared, batch_chunks=1)
    out = jax.block_until_ready(out)
    assert out.shape == (L, N, E)
    assert jnp.allclose(out, ref, atol=1e-3, rtol=1e-3), "mismatch vs JAX reference (1 chunk)"

    # Test 2: pipelined grid over batch chunks (Bc=8, a multiple of 8).
    L2, N2 = 8, 16
    tgt2 = jax.random.normal(k_tgt2, (L2, N2, E), jnp.float32)
    query_pos2 = jax.random.normal(k_pos2, (L2, N2, E), jnp.float32)
    ref2 = _reference(tgt2, query_pos2, params)
    out2 = self_attention_layer(tgt2, query_pos2, prepared, batch_chunks=2)
    out2 = jax.block_until_ready(out2)
    assert out2.shape == (L2, N2, E)
    assert jnp.allclose(out2, ref2, atol=1e-3, rtol=1e-3), "mismatch vs JAX reference (2 chunks)"

    print("KERNEL_OK")
</pallas_src>

<mosaic_0001>
module attributes {stable_mosaic.version = 11 : i64} {
  func.func @_self_attn_layer_kernel(%arg0: i32, %arg1: memref<8x2x32xf32, #tpu.memory_space<vmem>>, %arg2: memref<8x2x32xf32, #tpu.memory_space<vmem>>, %arg3: memref<32x32xf32, #tpu.memory_space<vmem>>, %arg4: memref<32x32xf32, #tpu.memory_space<vmem>>, %arg5: memref<32x32xf32, #tpu.memory_space<vmem>>, %arg6: memref<1x32xf32, #tpu.memory_space<vmem>>, %arg7: memref<1x32xf32, #tpu.memory_space<vmem>>, %arg8: memref<1x32xf32, #tpu.memory_space<vmem>>, %arg9: memref<32x32xf32, #tpu.memory_space<vmem>>, %arg10: memref<1x32xf32, #tpu.memory_space<vmem>>, %arg11: memref<1x32xf32, #tpu.memory_space<vmem>>, %arg12: memref<1x32xf32, #tpu.memory_space<vmem>>, %arg13: memref<8x2x32xf32, #tpu.memory_space<vmem>>) attributes {dimension_semantics = [#tpu.dimension_semantics<parallel>], iteration_bounds = array<i64: 1>, scalar_prefetch = 0 : i64, scratch_operands = 0 : i64, tpu.core_type = #tpu.core_type<tc>, window_params = [{transform_indices = @transform_0, window_bounds = array<i64: 8, 2, 32>}, {transform_indices = @transform_1, window_bounds = array<i64: 8, 2, 32>}, {pipeline_mode = #tpu.pipeline_mode<synchronous>, transform_indices = @transform_2, window_bounds = array<i64: 32, 32>}, {pipeline_mode = #tpu.pipeline_mode<synchronous>, transform_indices = @transform_3, window_bounds = array<i64: 32, 32>}, {pipeline_mode = #tpu.pipeline_mode<synchronous>, transform_indices = @transform_4, window_bounds = array<i64: 32, 32>}, {pipeline_mode = #tpu.pipeline_mode<synchronous>, transform_indices = @transform_5, window_bounds = array<i64: 1, 32>}, {pipeline_mode = #tpu.pipeline_mode<synchronous>, transform_indices = @transform_6, window_bounds = array<i64: 1, 32>}, {pipeline_mode = #tpu.pipeline_mode<synchronous>, transform_indices = @transform_7, window_bounds = array<i64: 1, 32>}, {pipeline_mode = #tpu.pipeline_mode<synchronous>, transform_indices = @transform_8, window_bounds = array<i64: 32, 32>}, {pipeline_mode = #tpu.pipeline_mode<synchronous>, transform_indices = @transform_9, window_bounds = array<i64: 1, 32>}, {pipeline_mode = #tpu.pipeline_mode<synchronous>, transform_indices = @transform_10, window_bounds = array<i64: 1, 32>}, {pipeline_mode = #tpu.pipeline_mode<synchronous>, transform_indices = @transform_11, window_bounds = array<i64: 1, 32>}, {transform_indices = @transform_12, window_bounds = array<i64: 8, 2, 32>}]} {
    %c0 = arith.constant 0 : index
    %c0_0 = arith.constant 0 : index
    %c0_1 = arith.constant 0 : index
    %0 = vector.load %arg1[%c0, %c0_0, %c0_1] : memref<8x2x32xf32, #tpu.memory_space<vmem>>, vector<8x2x32xf32>
    %1 = vector.shape_cast %0 : vector<8x2x32xf32> to vector<16x32xf32>
    %c0_2 = arith.constant 0 : index
    %c0_3 = arith.constant 0 : index
    %c0_4 = arith.constant 0 : index
    %2 = vector.load %arg2[%c0_2, %c0_3, %c0_4] : memref<8x2x32xf32, #tpu.memory_space<vmem>>, vector<8x2x32xf32>
    %3 = vector.shape_cast %2 : vector<8x2x32xf32> to vector<16x32xf32>
    %4 = arith.addf %1, %3 : vector<16x32xf32>
    %c0_5 = arith.constant 0 : index
    %c0_6 = arith.constant 0 : index
    %5 = vector.load %arg3[%c0_5, %c0_6] : memref<32x32xf32, #tpu.memory_space<vmem>>, vector<32x32xf32>
    %cst = arith.constant dense<0.000000e+00> : vector<16x32xf32>
    %6 = tpu.matmul %4, %5, %cst {dimension_numbers = #tpu.dot_dimension_numbers<[1], [0], [0], [1], [0, 0, 1, 1], [], []>} : vector<16x32xf32>, vector<32x32xf32>, vector<16x32xf32> -> vector<16x32xf32>
    %c0_7 = arith.constant 0 : index
    %c0_8 = arith.constant 0 : index
    %7 = vector.load %arg6[%c0_7, %c0_8] : memref<1x32xf32, #tpu.memory_space<vmem>>, vector<1x32xf32>
    %8 = vector.broadcast %7 : vector<1x32xf32> to vector<16x32xf32>
    %9 = arith.addf %6, %8 : vector<16x32xf32>
    %c0_9 = arith.constant 0 : index
    %c0_10 = arith.constant 0 : index
    %10 = vector.load %arg4[%c0_9, %c0_10] : memref<32x32xf32, #tpu.memory_space<vmem>>, vector<32x32xf32>
    %cst_11 = arith.constant dense<0.000000e+00> : vector<16x32xf32>
    %11 = tpu.matmul %4, %10, %cst_11 {dimension_numbers = #tpu.dot_dimension_numbers<[1], [0], [0], [1], [0, 0, 1, 1], [], []>} : vector<16x32xf32>, vector<32x32xf32>, vector<16x32xf32> -> vector<16x32xf32>
    %c0_12 = arith.constant 0 : index
    %c0_13 = arith.constant 0 : index
    %12 = vector.load %arg7[%c0_12, %c0_13] : memref<1x32xf32, #tpu.memory_space<vmem>>, vector<1x32xf32>
    %13 = vector.broadcast %12 : vector<1x32xf32> to vector<16x32xf32>
    %14 = arith.addf %11, %13 : vector<16x32xf32>
    %c0_14 = arith.constant 0 : index
    %c0_15 = arith.constant 0 : index
    %15 = vector.load %arg5[%c0_14, %c0_15] : memref<32x32xf32, #tpu.memory_space<vmem>>, vector<32x32xf32>
    %cst_16 = arith.constant dense<0.000000e+00> : vector<16x32xf32>
    %16 = tpu.matmul %1, %15, %cst_16 {dimension_numbers = #tpu.dot_dimension_numbers<[1], [0], [0], [1], [0, 0, 1, 1], [], []>} : vector<16x32xf32>, vector<32x32xf32>, vector<16x32xf32> -> vector<16x32xf32>
    %c0_17 = arith.constant 0 : index
    %c0_18 = arith.constant 0 : index
    %17 = vector.load %arg8[%c0_17, %c0_18] : memref<1x32xf32, #tpu.memory_space<vmem>>, vector<1x32xf32>
    %18 = vector.broadcast %17 : vector<1x32xf32> to vector<16x32xf32>
    %19 = arith.addf %16, %18 : vector<16x32xf32>
    %20 = vector.shape_cast %9 : vector<16x32xf32> to vector<8x2x4x8xf32>
    %21 = tpu.transpose %20, [1, 2, 0, 3] : vector<8x2x4x8xf32> -> vector<2x4x8x8xf32>
    %22 = vector.shape_cast %21 : vector<2x4x8x8xf32> to vector<8x8x8xf32>
    %23 = vector.shape_cast %14 : vector<16x32xf32> to vector<8x2x4x8xf32>
    %24 = tpu.transpose %23, [1, 2, 0, 3] : vector<8x2x4x8xf32> -> vector<2x4x8x8xf32>
    %25 = vector.shape_cast %24 : vector<2x4x8x8xf32> to vector<8x8x8xf32>
    %26 = vector.shape_cast %19 : vector<16x32xf32> to vector<8x2x4x8xf32>
    %27 = tpu.transpose %26, [1, 2, 0, 3] : vector<8x2x4x8xf32> -> vector<2x4x8x8xf32>
    %28 = vector.shape_cast %27 : vector<2x4x8x8xf32> to vector<8x8x8xf32>
    "tpu.trace_start"() <{level = 10 : i32, message = "bld,bmd->blm"}> : () -> ()
    %cst_19 = arith.constant dense<0.000000e+00> : vector<8x8x8xf32>
    %29 = tpu.matmul %22, %25, %cst_19 {dimension_numbers = #tpu.dot_dimension_numbers<[2], [2], [1], [1], [0, 0, 0, 1, 1, 1], [0], [0]>} : vector<8x8x8xf32>, vector<8x8x8xf32>, vector<8x8x8xf32> -> vector<8x8x8xf32>
    "tpu.trace_stop"() : () -> ()
    %cst_20 = arith.constant dense<0xFF800000> : vector<8x8xf32>
    %30 = vector.multi_reduction <maximumf>, %29, %cst_20 [2] : vector<8x8x8xf32> to vector<8x8xf32>
    %31 = vector.shape_cast %30 : vector<8x8xf32> to vector<8x8x1xf32>
    %32 = vector.broadcast %31 : vector<8x8x1xf32> to vector<8x8x8xf32>
    %33 = arith.subf %29, %32 : vector<8x8x8xf32>
    %34 = math.exp %33 : vector<8x8x8xf32>
    %cst_21 = arith.constant dense<0.000000e+00> : vector<8x8xf32>
    %35 = vector.multi_reduction <add>, %34, %cst_21 [2] : vector<8x8x8xf32> to vector<8x8xf32>
    %36 = vector.shape_cast %35 : vector<8x8xf32> to vector<8x8x1xf32>
    %37 = vector.broadcast %36 : vector<8x8x1xf32> to vector<8x8x8xf32>
    %38 = arith.divf %34, %37 : vector<8x8x8xf32>
    "tpu.trace_start"() <{level = 10 : i32, message = "blm,bmd->bld"}> : () -> ()
    %cst_22 = arith.constant dense<0.000000e+00> : vector<8x8x8xf32>
    %39 = tpu.matmul %38, %28, %cst_22 {dimension_numbers = #tpu.dot_dimension_numbers<[2], [1], [1], [2], [0, 0, 0, 1, 1, 2], [0], [0]>} : vector<8x8x8xf32>, vector<8x8x8xf32>, vector<8x8x8xf32> -> vector<8x8x8xf32>
    "tpu.trace_stop"() : () -> ()
    %40 = vector.shape_cast %39 : vector<8x8x8xf32> to vector<2x4x8x8xf32>
    %41 = tpu.transpose %40, [2, 0, 1, 3] : vector<2x4x8x8xf32> -> vector<8x2x4x8xf32>
    %42 = vector.shape_cast %41 : vector<8x2x4x8xf32> to vector<16x32xf32>
    %c0_23 = arith.constant 0 : index
    %c0_24 = arith.constant 0 : index
    %43 = vector.load %arg9[%c0_23, %c0_24] : memref<32x32xf32, #tpu.memory_space<vmem>>, vector<32x32xf32>
    %cst_25 = arith.constant dense<0.000000e+00> : vector<16x32xf32>
    %44 = tpu.matmul %42, %43, %cst_25 {dimension_numbers = #tpu.dot_dimension_numbers<[1], [0], [0], [1], [0, 0, 1, 1], [], []>} : vector<16x32xf32>, vector<32x32xf32>, vector<16x32xf32> -> vector<16x32xf32>
    %c0_26 = arith.constant 0 : index
    %c0_27 = arith.constant 0 : index
    %45 = vector.load %arg10[%c0_26, %c0_27] : memref<1x32xf32, #tpu.memory_space<vmem>>, vector<1x32xf32>
    %46 = vector.broadcast %45 : vector<1x32xf32> to vector<16x32xf32>
    %47 = arith.addf %44, %46 : vector<16x32xf32>
    %48 = arith.addf %1, %47 : vector<16x32xf32>
    %cst_28 = arith.constant dense<0.000000e+00> : vector<16xf32>
    %49 = vector.multi_reduction <add>, %48, %cst_28 [1] : vector<16x32xf32> to vector<16xf32>
    %50 = vector.shape_cast %49 : vector<16xf32> to vector<16x1xf32>
    %cst_29 = arith.constant 3.200000e+01 : f32
    %51 = vector.broadcast %cst_29 : f32 to vector<16x1xf32>
    %52 = arith.divf %50, %51 : vector<16x1xf32>
    %53 = vector.broadcast %52 : vector<16x1xf32> to vector<16x32xf32>
    %54 = arith.subf %48, %53 : vector<16x32xf32>
    %55 = arith.mulf %54, %54 : vector<16x32xf32>
    %cst_30 = arith.constant dense<0.000000e+00> : vector<16xf32>
    %56 = vector.multi_reduction <add>, %55, %cst_30 [1] : vector<16x32xf32> to vector<16xf32>
    %57 = vector.shape_cast %56 : vector<16xf32> to vector<16x1xf32>
    %cst_31 = arith.constant 3.200000e+01 : f32
    %58 = vector.broadcast %cst_31 : f32 to vector<16x1xf32>
    %59 = arith.divf %57, %58 : vector<16x1xf32>
    %60 = vector.broadcast %52 : vector<16x1xf32> to vector<16x32xf32>
    %61 = arith.subf %48, %60 : vector<16x32xf32>
    %cst_32 = arith.constant 9.99999974E-6 : f32
    %62 = vector.broadcast %cst_32 : f32 to vector<16x1xf32>
    %63 = arith.addf %59, %62 : vector<16x1xf32>
    %64 = math.rsqrt %63 : vector<16x1xf32>
    %65 = vector.broadcast %64 : vector<16x1xf32> to vector<16x32xf32>
    %66 = arith.mulf %61, %65 : vector<16x32xf32>
    %c0_33 = arith.constant 0 : index
    %c0_34 = arith.constant 0 : index
    %67 = vector.load %arg11[%c0_33, %c0_34] : memref<1x32xf32, #tpu.memory_space<vmem>>, vector<1x32xf32>
    %68 = vector.broadcast %67 : vector<1x32xf32> to vector<16x32xf32>
    %69 = arith.mulf %66, %68 : vector<16x32xf32>
    %c0_35 = arith.constant 0 : index
    %c0_36 = arith.constant 0 : index
    %70 = vector.load %arg12[%c0_35, %c0_36] : memref<1x32xf32, #tpu.memory_space<vmem>>, vector<1x32xf32>
    %71 = vector.broadcast %70 : vector<1x32xf32> to vector<16x32xf32>
    %72 = arith.addf %69, %71 : vector<16x32xf32>
    %73 = vector.shape_cast %72 : vector<16x32xf32> to vector<8x2x32xf32>
    %c0_37 = arith.constant 0 : index
    %c0_38 = arith.constant 0 : index
    %c0_39 = arith.constant 0 : index
    %74 = vector.load %arg13[%c0_37, %c0_38, %c0_39] : memref<8x2x32xf32, #tpu.memory_space<vmem>>, vector<8x2x32xf32>
    tpu.vector_store %arg13[%c0_37, %c0_38, %c0_39], %73 {strides = array<i32>} : memref<8x2x32xf32, #tpu.memory_space<vmem>>, vector<8x2x32xf32>,
    return
  }
  func.func @transform_0(%arg0: i32) -> (i32, i32, i32) {
    %c0_i32 = arith.constant 0 : i32
    %c0_i32_0 = arith.constant 0 : i32
    %c0_i32_1 = arith.constant 0 : i32
    return %c0_i32, %arg0, %c0_i32_0 : i32, i32, i32
  }
  func.func @transform_1(%arg0: i32) -> (i32, i32, i32) {
    %c0_i32 = arith.constant 0 : i32
    %c0_i32_0 = arith.constant 0 : i32
    %c0_i32_1 = arith.constant 0 : i32
    return %c0_i32, %arg0, %c0_i32_0 : i32, i32, i32
  }
  func.func @transform_2(%arg0: i32) -> (i32, i32) {
    %c0_i32 = arith.constant 0 : i32
    %c0_i32_0 = arith.constant 0 : i32
    %c0_i32_1 = arith.constant 0 : i32
    return %c0_i32, %c0_i32_0 : i32, i32
  }
  func.func @transform_3(%arg0: i32) -> (i32, i32) {
    %c0_i32 = arith.constant 0 : i32
    %c0_i32_0 = arith.constant 0 : i32
    %c0_i32_1 = arith.constant 0 : i32
    return %c0_i32, %c0_i32_0 : i32, i32
  }
  func.func @transform_4(%arg0: i32) -> (i32, i32) {
    %c0_i32 = arith.constant 0 : i32
    %c0_i32_0 = arith.constant 0 : i32
    %c0_i32_1 = arith.constant 0 : i32
    return %c0_i32, %c0_i32_0 : i32, i32
  }
  func.func @transform_5(%arg0: i32) -> (i32, i32) {
    %c0_i32 = arith.constant 0 : i32
    %c0_i32_0 = arith.constant 0 : i32
    %c0_i32_1 = arith.constant 0 : i32
    return %c0_i32, %c0_i32_0 : i32, i32
  }
  func.func @transform_6(%arg0: i32) -> (i32, i32) {
    %c0_i32 = arith.constant 0 : i32
    %c0_i32_0 = arith.constant 0 : i32
    %c0_i32_1 = arith.constant 0 : i32
    return %c0_i32, %c0_i32_0 : i32, i32
  }
  func.func @transform_7(%arg0: i32) -> (i32, i32) {
    %c0_i32 = arith.constant 0 : i32
    %c0_i32_0 = arith.constant 0 : i32
    %c0_i32_1 = arith.constant 0 : i32
    return %c0_i32, %c0_i32_0 : i32, i32
  }
  func.func @transform_8(%arg0: i32) -> (i32, i32) {
    %c0_i32 = arith.constant 0 : i32
    %c0_i32_0 = arith.constant 0 : i32
    %c0_i32_1 = arith.constant 0 : i32
    return %c0_i32, %c0_i32_0 : i32, i32
  }
  func.func @transform_9(%arg0: i32) -> (i32, i32) {
    %c0_i32 = arith.constant 0 : i32
    %c0_i32_0 = arith.constant 0 : i32
    %c0_i32_1 = arith.constant 0 : i32
    return %c0_i32, %c0_i32_0 : i32, i32
  }
  func.func @transform_10(%arg0: i32) -> (i32, i32) {
    %c0_i32 = arith.constant 0 : i32
    %c0_i32_0 = arith.constant 0 : i32
    %c0_i32_1 = arith.constant 0 : i32
    return %c0_i32, %c0_i32_0 : i32, i32
  }
  func.func @transform_11(%arg0: i32) -> (i32, i32) {
    %c0_i32 = arith.constant 0 : i32
    %c0_i32_0 = arith.constant 0 : i32
    %c0_i32_1 = arith.constant 0 : i32
    return %c0_i32, %c0_i32_0 : i32, i32
  }
  func.func @transform_12(%arg0: i32) -> (i32, i32, i32) {
    %c0_i32 = arith.constant 0 : i32
    %c0_i32_0 = arith.constant 0 : i32
    %c0_i32_1 = arith.constant 0 : i32
    return %c0_i32, %arg0, %c0_i32_0 : i32, i32, i32
  }
}

</mosaic_0001>

<bundles_post_ra>
// kernel: self_attention_layer.1
= control target key start
LH: loop header
LB: loop body
LE: loop exit
PB: predicated region body
PF: predicated region fallthrough
CT: control target
= control target key end

     0   :  { %17 = vsyncpa [#allocation3], 0  ;;  %s4674_s0 = inlined_call_operand.hbm [shape: f32[8,2,32], index: 0, kind: input, shape index: {}]   ;;  %s4675_s1 = inlined_call_operand.hbm [shape: f32[8,2,32], index: 1, kind: input, shape index: {}]   ;;  %s4676_s2 = inlined_call_operand.vmem [shape: f32[32,32], index: 2, kind: input, shape index: {}]   ;;  %s4677_s3 = inlined_call_operand.hbm [shape: f32[32,32], index: 3, kind: input, shape index: {}]   ;;  %s4678_s4 = inlined_call_operand.hbm [shape: f32[32,32], index: 4, kind: input, shape index: {}]   ;;  %s4679_s5 = inlined_call_operand.vmem [shape: f32[1,32], index: 5, kind: input, shape index: {}]   ;;  %s4680_s6 = inlined_call_operand.vmem [shape: f32[1,32], index: 6, kind: input, shape index: {}]   ;;  %s4681_s7 = inlined_call_operand.vmem [shape: f32[1,32], index: 7, kind: input, shape index: {}]   ;;  %s4682_s8 = inlined_call_operand.hbm [shape: f32[32,32], index: 8, kind: input, shape index: {}]   ;;  %s4683_s9 = inlined_call_operand.vmem [shape: f32[1,32], index: 9, kind: input, shape index: {}]   ;;  %s4684_s10 = inlined_call_operand.vmem [shape: f32[1,32], index: 10, kind: input, shape index: {}]   ;;  %s4685_s11 = inlined_call_operand.hbm [shape: f32[1,32], index: 11, kind: input, shape index: {}]   ;;  %s4686_s12 = inlined_call_operand.hbm [shape: f32[8,2,32], index: 12, kind: output, shape index: {}]  }
   0x1   :  { %18 = vsyncpa [#allocation6], 0 }
   0x2   :  { %19 = vsyncpa [#allocation9], 0 }
   0x3   :  { %20 = vsyncpa [#allocation12], 0 }
   0x4   :  { %21 = vsyncpa [#allocation4], 0  ;;  %s3960_s21 = smov [#allocation5]   ;;  %s3796_s25 = scalar_lea.hbm %s4675_s1, 256 }
   0x5   :  { %s39_s22 = sshll.u32 %s3960_s21, 4  ;;  %p3797_p0 = scmp.ne.s32.totalorder %s4675_s1, %s3796_s25  ;;  %s40_s22 = int_to_ptr.vmem [resolvable:$true] %s39_s22 }
   0x6   :  { %p3800_p1 = scmp.lt.u32.totalorder %s3796_s25, %s4675_s1 }
   0x8   :  { %p3802_p2 = pnand %p3800_p1, %p3797_p0 }
   0xa   :  { %3805 = shalt.err (!%p3802_p2)
}
   0xb   :  { %s3806_s30 = scalar_lea.vmem %s40_s22, 256  ;;  %p3811_p4 = scmp.lt.s32.totalorder %s40_s22, %s40_s22 }
   0xc   :  { %p3807_p3 = scmp.ne.s32.totalorder %s40_s22, %s3806_s30  ;;  %p3812_p5 = scmp.lt.s32.totalorder %s3806_s30, %s3806_s30 }
   0xe   :  { %p3813_p6 = por %p3812_p5, %p3811_p4 }
  0x10   :  { %p3814_p7 = pnand %p3813_p6, %p3807_p3 }
  0x12   :  { %3817 = shalt.err (!%p3814_p7)
}
  0x13   :  { %s3961_s13 = smov 32   ;;  %s3962_s14 = smov 2  }
  0x14   :  { %45 = dma.hbm_to_vmem [thread:$0]  %s4675_s1, 256, %s40_s22, [#allocation6], %s3961_s13, %s3961_s13, %s3962_s14  }
  0x15   :  { %s3963_s17 = smov [#allocation8]   ;;  %s3964_s19 = smov [#allocation2]  }
  0x16   :  { %s65_s18 = sshll.u32 %s3963_s17, 4  ;;  %s27_s20 = sshll.u32 %s3964_s19, 4  ;;  %s66_s18 = int_to_ptr.vmem [resolvable:$true] %s65_s18  ;;  %s28_s20 = int_to_ptr.vmem [resolvable:$true] %s27_s20 }
  0x17   :  { %s3818_s24 = scalar_lea.hbm %s4678_s4, 512 }
  0x18   :  { %p3819_p8 = scmp.ne.s32.totalorder %s4678_s4, %s3818_s24  ;;  %p3822_p9 = scmp.lt.u32.totalorder %s3818_s24, %s4678_s4 }
  0x1a   :  { %p3824_p10 = pnand %p3822_p9, %p3819_p8 }
  0x1c   :  { %3827 = shalt.err (!%p3824_p10)
}
  0x1d   :  { %s3828_s1 = scalar_lea.vmem %s66_s18, 512  ;;  %p3833_p12 = scmp.lt.s32.totalorder %s66_s18, %s66_s18 }
  0x1e   :  { %p3829_p11 = scmp.ne.s32.totalorder %s66_s18, %s3828_s1  ;;  %p3834_p13 = scmp.lt.s32.totalorder %s3828_s1, %s3828_s1 }
  0x20   :  { %p3835_p0 = por %p3834_p13, %p3833_p12 }
  0x22   :  { %p3836_p1 = pnand %p3835_p0, %p3829_p11 }
  0x24   :  { %3839 = shalt.err (!%p3836_p1)
}
  0x25   :  { %s3965_s22 = smov 128   ;;  %s3966_s29 = smov 8  }
  0x26   :  { %71 = dma.hbm_to_vmem [thread:$0]  %s4678_s4, 512, %s66_s18, [#allocation9], %s3965_s22, %s3965_s22, %s3966_s29  }
  0x27   :  { %s3840_s19 = scalar_lea.hbm %s4674_s0, 256 }
  0x28   :  { %p3841_p2 = scmp.ne.s32.totalorder %s4674_s0, %s3840_s19  ;;  %p3844_p3 = scmp.lt.u32.totalorder %s3840_s19, %s4674_s0 }
  0x2a   :  { %p3846_p4 = pnand %p3844_p3, %p3841_p2 }
  0x2c   :  { %3849 = shalt.err (!%p3846_p4)
}
  0x2d   :  { %s3850_s26 = scalar_lea.vmem %s28_s20, 256  ;;  %p3855_p6 = scmp.lt.s32.totalorder %s28_s20, %s28_s20 }
  0x2e   :  { %p3851_p5 = scmp.ne.s32.totalorder %s28_s20, %s3850_s26  ;;  %p3856_p7 = scmp.lt.s32.totalorder %s3850_s26, %s3850_s26 }
  0x30   :  { %p3857_p8 = por %p3856_p7, %p3855_p6 }
  0x32   :  { %p3858_p9 = pnand %p3857_p8, %p3851_p5 }
  0x34   :  { %3861 = shalt.err (!%p3858_p9)
}
  0x35   :  { %33 = dma.hbm_to_vmem [thread:$0]  %s4674_s0, 256, %s28_s20, [#allocation3], %s3961_s13, %s3961_s13, %s3962_s14  }
  0x36   :  { %s3967_s27 = smov [#allocation7]   ;;  %s3968_s1 = smov [#allocation10]  }
  0x37   :  { %s53_s28 = sshll.u32 %s3967_s27, 4  ;;  %s83_s30 = sshll.u32 %s3968_s1, 4  ;;  %s54_s28 = int_to_ptr.vmem [resolvable:$true] %s53_s28  ;;  %s84_s30 = int_to_ptr.vmem [resolvable:$true] %s83_s30 }
  0x38   :  { %s3862_s17 = scalar_lea.hbm %s4677_s3, 512 }
  0x39   :  { %p3863_p10 = scmp.ne.s32.totalorder %s4677_s3, %s3862_s17  ;;  %p3866_p11 = scmp.lt.u32.totalorder %s3862_s17, %s4677_s3 }
  0x3b   :  { %p3868_p12 = pnand %p3866_p11, %p3863_p10 }
  0x3d   :  { %3871 = shalt.err (!%p3868_p12)
}
  0x3e   :  { %s3872_s0 = scalar_lea.vmem %s54_s28, 512  ;;  %p3877_p0 = scmp.lt.s32.totalorder %s54_s28, %s54_s28 }
  0x3f   :  { %p3873_p13 = scmp.ne.s32.totalorder %s54_s28, %s3872_s0  ;;  %p3878_p1 = scmp.lt.s32.totalorder %s3872_s0, %s3872_s0 }
  0x41   :  { %p3879_p2 = por %p3878_p1, %p3877_p0 }
  0x43   :  { %p3880_p3 = pnand %p3879_p2, %p3873_p13 }
  0x45   :  { %3883 = shalt.err (!%p3880_p3)
}
  0x46   :  { %59 = dma.hbm_to_vmem [thread:$0]  %s4677_s3, 512, %s54_s28, [#allocation6], %s3965_s22, %s3965_s22, %s3966_s29  }
  0x47   :  { %s3884_s18 = scalar_lea.hbm %s4682_s8, 512 }
  0x48   :  { %p3885_p4 = scmp.ne.s32.totalorder %s4682_s8, %s3884_s18  ;;  %p3888_p5 = scmp.lt.u32.totalorder %s3884_s18, %s4682_s8 }
  0x4a   :  { %p3890_p6 = pnand %p3888_p5, %p3885_p4 }
  0x4c   :  { %3893 = shalt.err (!%p3890_p6)
}
  0x4d   :  { %s3894_s17 = scalar_lea.vmem %s84_s30, 512  ;;  %p3899_p8 = scmp.lt.s32.totalorder %s84_s30, %s84_s30 }
  0x4e   :  { %p3895_p7 = scmp.ne.s32.totalorder %s84_s30, %s3894_s17  ;;  %p3900_p9 = scmp.lt.s32.totalorder %s3894_s17, %s3894_s17 }
  0x50   :  { %p3901_p10 = por %p3900_p9, %p3899_p8 }
  0x52   :  { %p3902_p11 = pnand %p3901_p10, %p3895_p7 }
  0x54   :  { %3905 = shalt.err (!%p3902_p11)
}
  0x55   :  { %89 = dma.hbm_to_vmem [thread:$0]  %s4682_s8, 512, %s84_s30, [#allocation9], %s3965_s22, %s3965_s22, %s3966_s29  }
  0x56   :  { %s3969_s19 = smov [#allocation11]   ;;  %s3906_s0 = scalar_lea.hbm %s4685_s11, 16 }
  0x57   :  { %s100_s21 = sshll.u32 %s3969_s19, 4  ;;  %p3907_p12 = scmp.ne.s32.totalorder %s4685_s11, %s3906_s0  ;;  %s101_s21 = int_to_ptr.vmem [resolvable:$true] %s100_s21 }
  0x58   :  { %p3910_p13 = scmp.lt.u32.totalorder %s3906_s0, %s4685_s11 }
  0x5a   :  { %p3912_p0 = pnand %p3910_p13, %p3907_p12 }
  0x5c   :  { %3915 = shalt.err (!%p3912_p0)
}
  0x5d   :  { %s3916_s18 = scalar_lea.vmem %s101_s21, 16  ;;  %s3920_s8 = scalar_lea.vmem %s101_s21, 32 }
  0x5e   :  { %p3917_p1 = scmp.ne.s32.totalorder %s101_s21, %s3916_s18  ;;  %p3921_p2 = scmp.lt.s32.totalorder %s101_s21, %s101_s21 }
  0x5f   :  { %p3922_p3 = scmp.lt.s32.totalorder %s3920_s8, %s3916_s18 }
  0x61   :  { %p3923_p4 = por %p3922_p3, %p3921_p2 }
  0x63   :  { %p3924_p5 = pnand %p3923_p4, %p3917_p1 }
  0x65   :  { %3927 = shalt.err (!%p3924_p5)
}
  0x66   :  { %103 = dma.hbm_to_vmem [thread:$0]  %s4685_s11, 16, %s101_s21, [#allocation12]  }
  0x67   :  { %3950 = dma.done.wait [#allocation3], 256  }
  0x68   :  { %3951 = vsyncadd [#allocation3], 4294967040 }
  0x69   :  { %3952 = dma.done.wait [#allocation6], 768  }
  0x6a   :  { %3953 = vsyncadd [#allocation6], 4294966528 }
  0x6b   :  { %3954 = dma.done.wait [#allocation9], 1024  }
  0x6c   :  { %3955 = vsyncadd [#allocation9], 4294966272 }
  0x6d   :  { %3956 = dma.done.wait [#allocation12], 16  }
  0x6e   :  { %3957 = vsyncadd [#allocation12], 4294967280  ;;  %v3970_v0 = vmov 1983009808   ;;  %v170_v2 = vlaneseq  ;;  %v279_v3 = vld [vmem:[#allocation7] sm:$0xff]  ;;  %v280_v4 = vld [vmem:[#allocation7 + $0x8] sm:$0xff] }
  0x6f   :  { %v168_v1 = vunpack.c.l.s4 %v3970_v0  ;;  %v281_v5 = vld [vmem:[#allocation7 + $0x10] sm:$0xff]  ;;  %v3704_v8 = vpack.c.bf16 %v280_v4, %v279_v3  ;;  %v282_v9 = vld [vmem:[#allocation7 + $0x18] sm:$0xff]  ;;  %v146_v10 = vld [vmem:[%s4676_s2] sm:$0xff]  ;;  %vm199_vm0 = vcmask 261120   ;;  %s3971_s21 = smov 112   ;;  %s3972_s23 = smov 120  }
  0x70   :  { %v4136_v7 = vshrl.u32 %v170_v2, 7  ;;  %v147_v11 = vld [vmem:[%s4676_s2 + $0x8] sm:$0xff]  ;;  %v3708_v12 = vpack.c.bf16 %v282_v9, %v281_v5  ;;  %v4144_v14 = vld [vmem:[#allocation2] sm:$0x3]  ;;  %v4146_v15 = vld [vmem:[#allocation2 + $0x2] sm:$0x3] }
  0x71   :  { %v169_v6 = vunpack.c.0.s8 %v168_v1  ;;  %v3696_v13 = vpack.c.bf16 %v147_v11, %v146_v10  ;;  %v4148_v16 = vld [vmem:[#allocation2 + $0x4] sm:$0x3]  ;;  %3705 = vmatprep.subr.bf16.mxu1 %v3704_v8  ;;  %v4150_v17 = vld [vmem:[#allocation2 + $0x6] sm:$0x3]  ;;  %v130_v18 = vld [vmem:[#allocation5] sm:$0x3]  ;;  %v384_v4 = vcombine.low %v4144_v14, %v4146_v15 }
  0x72   :  { %v131_v19 = vld [vmem:[#allocation5 + $0x2] sm:$0x3]  ;;  %3707 = vmatpush3.bf16.msra.mxu1 %v3704_v8  ;;  %v132_v20 = vld [vmem:[#allocation5 + $0x4] sm:$0x3]  ;;  %v133_v21 = vld [vmem:[#allocation5 + $0x6] sm:$0x3]  ;;  %v138_v22 = vadd.f32 %v130_v18, %v4144_v14  ;;  %v385_v5 = vcombine.low %v4148_v16, %v4150_v17 }
  0x73   :  { %3697 = vmatprep.subr.bf16.mxu0 %v3696_v13  ;;  %v139_v23 = vadd.f32 %v131_v19, %v4146_v15  ;;  %v4155_v24 = vsub.s32 %v169_v6, %v4136_v7  ;;  %v4157_v25 = vld [vmem:[#allocation2 + $0x8] sm:$0x3]  ;;  %3709 = vmatprep.subr.bf16.mxu1 %v3708_v12  ;;  %v140_v26 = vadd.f32 %v132_v20, %v4148_v16  ;;  %v4161_v28 = vld [vmem:[#allocation2 + $0xa] sm:$0x3]  ;;  %v4163_v29 = vld [vmem:[#allocation2 + $0xc] sm:$0x3] }
  0x74   :  { %v141_v27 = vadd.f32 %v133_v21, %v4150_v17  ;;  %3699 = vmatpush3.bf16.msra.mxu0 %v3696_v13  ;;  %v4165_v30 = vld [vmem:[#allocation2 + $0xe] sm:$0x3]  ;;  %v134_v32 = vld [vmem:[#allocation5 + $0x8] sm:$0x3]  ;;  %v135_v33 = vld [vmem:[#allocation5 + $0xa] sm:$0x3]  ;;  %v401_v6 = vcombine.low %v4157_v25, %v4161_v28 }
  0x75   :  { %v165_v31 = vcombine.low %v138_v22, %v139_v23  ;;  %v136_v34 = vld [vmem:[#allocation5 + $0xc] sm:$0x3]  ;;  %v137_v36 = vld [vmem:[#allocation5 + $0xe] sm:$0x3]  ;;  %v142_v37 = vadd.f32 %v134_v32, %v4157_v25  ;;  %v143_v38 = vadd.f32 %v135_v33, %v4161_v28  ;;  %v148_v40 = vld [vmem:[%s4676_s2 + $0x10] sm:$0xff]  ;;  %v402_v8 = vcombine.low %v4163_v29, %v4165_v30  ;;  %s3978_s25 = smov 16  }
  0x76   :  { %v166_v35 = vcombine.low %v140_v26, %v141_v27  ;;  %v144_v39 = vadd.f32 %v136_v34, %v4163_v29  ;;  %v149_v41 = vld [vmem:[%s4676_s2 + $0x18] sm:$0xff]  ;;  %3711 = vmatpush3.bf16.msra.mxu1 %v3708_v12  ;;  %v145_v43 = vadd.f32 %v137_v36, %v4165_v30  ;;  %v3469_v52 = vld [vmem:[%s4680_s6] ss:$0 sm:$0xff]  ;;  %s3973_s6 = smov 104   ;;  %v366_v63 = vld [vmem:[#allocation8 + $0x8] sm:$0xff]  ;;  %v392_v9 = vrot.slane %v384_v4, %v4155_v24 }
  0x77   :  { %v173_v42 = vrot.slane %v165_v31, %v4155_v24  ;;  %v3700_v44 = vpack.c.bf16 %v149_v41, %v148_v40  ;;  %v182_v46 = vcombine.low %v142_v37, %v143_v38  ;;  %v3466_v58 = vld [vmem:[%s4679_s5] ss:$0 sm:$0xff]  ;;  %v367_v1 = vld [vmem:[#allocation8 + $0x10] sm:$0xff]  ;;  %v368_v2 = vld [vmem:[#allocation8 + $0x18] sm:$0xff]  ;;  %v399_v10 = vrot.slane %v385_v5, %v4155_v24 }
  0x78   :  { %v180_v45 = vrot.slane %v166_v35, %v4155_v24  ;;  %v183_v47 = vcombine.low %v144_v39, %v145_v43  ;;  %v365_v62 = vld [vmem:[#allocation8] sm:$0xff]  ;;  %v3716_v3 = vpack.c.bf16 %v368_v2, %v367_v1  ;;  %v409_v11 = vrot.slane %v401_v6, %v4155_v24 }
  0x79   :  { %3701 = vmatprep.subr.bf16.mxu0 %v3700_v44  ;;  %v190_v49 = vrot.slane %v182_v46, %v4155_v24  ;;  %v3712_v0 = vpack.c.bf16 %v366_v63, %v365_v62  ;;  %v416_v12 = vrot.slane %v402_v8, %v4155_v24  ;;  %v400_v13 = vcombine.low %v392_v9, %v399_v10 }
  0x7a   :  { %v181_v48 = vcombine.low %v173_v42, %v180_v45  ;;  %3703 = vmatpush3.bf16.msra.mxu0 %v3700_v44  ;;  %v197_v50 = vrot.slane %v183_v47, %v4155_v24  ;;  %v3974_v14 = vmov 0.0   ;;  %vm3975_vm1 = vmmov 0  }
  0x7b   :  { %3713 = vmatprep.subr.bf16.mxu0 %v3712_v0  ;;  %v417_v18 = vcombine.low %v409_v11, %v416_v12  ;;  %3605 = vmatprep.subr.mxu1 %v3974_v14  ;;  %v3976_v15 = vmov 1934713408   ;;  %vm1373_vm2 = vcmask 64512   ;;  %vm2952_vm3 = vcmask 130048  }
  0x7c   :  { %3591 = vmatprep.mubr.msk.f32.mxu1 %vm199_vm0, %v181_v48  ;;  %3580 = vmatprep.mubr.msk.f32.mxu0 %vm199_vm0, %v181_v48  ;;  %v198_v51 = vcombine.low %v190_v49, %v197_v50  ;;  %v552_v16 = vunpack.c.l.s4 %v3976_v15  ;;  %vm2955_vm4 = vcmask 195584   ;;  %vm3437_vm5 = vcmask 254976  }
  0x7e   :  { %3592 = vmatmul.mubr.msk.f32.vlgmr.msra.gmra.mrb[0].mxu1 %vm199_vm0, %v198_v51  ;;  %3581 = vmatmul.mubr.msk.f32.vlgmr.msra.gmra.mrb[0].mxu0 %vm199_vm0, %v198_v51  ;;  %v553_v20 = vunpack.c.0.s8 %v552_v16 }
  0x7f   :  { %3715 = vmatpush3.bf16.msra.mxu0 %v3712_v0  ;;  %3602 = vmatprep.mubr.msk.f32.mxu0 %vm199_vm0, %v400_v13 }
  0x80   :  { %3717 = vmatprep.subr.bf16.mxu0 %v3716_v3  ;;  %3607 = vmatprep.mubr.msk.f32.mxu1 %vm3975_vm1, %v3974_v14  ;;  %v4246_v28 = vsub.s32 %v553_v20, %v4136_v7 }
  0x83   :  { %3719 = vmatpush3.bf16.msra.mxu0 %v3716_v3 }
  0x84   :  { %3625 = vmatprep.subr.mxu0 %v3974_v14 }
  0x86   :  { %3603 = vmatmul.mubr.msk.f32.vlgmr.msra.gmra.mrb[2].mxu0 %vm199_vm0, %v417_v18 }
  0x87   :  { %3627 = vmatprep.mubr.msk.f32.mxu0 %vm3975_vm1, %v3974_v14 }
 0x151   :  { %v3593_v53 = vpop.f32.mrb[0].mxu1  ;;  %v3582_v54 = vpop.f32.mrb[0].mxu0 }
 0x152   :  { %v4188_v55 = vadd.f32 %v3593_v53, %v3469_v52  ;;  %v356_v56 = vpop.f32.mrb[1].mxu1  ;;  %v270_v57 = vpop.f32.mrb[1].mxu0  ;;  %v4203_v60 = vadd.f32 %v3582_v54, %v3466_v58 }
 0x153   :  { %v4197_v59 = vadd.f32 %v3469_v52, %v356_v56  ;;  %v4209_v61 = vadd.f32 %v3466_v58, %v270_v57 }
 0x154   :  { %799 = vrot.lane.b32.xlu1 %v4188_v55, %s3971_s21  ;;  %793 = vrot.lane.b32.xlu0 %v4188_v55, %s3972_s23 }
 0x158   :  { %805 = vrot.lane.b32.xlu1 %v4188_v55, %s3973_s6  ;;  %791 = vrot.lane.b32.xlu0 %v4197_v59, %s3972_s23 }
 0x15c   :  { %803 = vrot.lane.b32.xlu0 %v4197_v59, %s3973_s6  ;;  %501 = vrot.lane.b32.xlu1 %v4203_v60, %s3972_s23 }
 0x160   :  { %507 = vrot.lane.b32.xlu1 %v4203_v60, %s3971_s21  ;;  %499 = vrot.lane.b32.xlu0 %v4209_v61, %s3972_s23 }
 0x164   :  { %797 = vrot.lane.b32.xlu1 %v4197_v59, %s3971_s21  ;;  %505 = vrot.lane.b32.xlu0 %v4209_v61, %s3971_s21 }
 0x168   :  { %513 = vrot.lane.b32.xlu1 %v4203_v60, %s3973_s6  ;;  %511 = vrot.lane.b32.xlu0 %v4209_v61, %s3973_s6 }
 0x1c6   :  { %v800_v17 = vpop.permute.xlu1 %799  ;;  %v794_v19 = vpop.permute.xlu0 %793 }
 0x1c7   :  { %v877_v21 = vcombine.low %v4188_v55, %v800_v17  ;;  %v878_v22 = vcombine.high %v4188_v55, %v800_v17 }
 0x1c9   :  { %v885_v29 = vrot.slane %v877_v21, %v4155_v24  ;;  %v892_v30 = vrot.slane %v878_v22, %v4155_v24 }
 0x1ca   :  { %v806_v23 = vpop.permute.xlu1 %805  ;;  %v792_v25 = vpop.permute.xlu0 %791 }
 0x1cb   :  { %v893_v26 = vcombine.low %v794_v19, %v806_v23  ;;  %v894_v27 = vcombine.high %v794_v19, %v806_v23 }
 0x1cd   :  { %v901_v31 = vrot.slane %v893_v26, %v4155_v24  ;;  %v908_v32 = vrot.slane %v894_v27, %v4155_v24 }
 0x1ce   :  { %v804_v33 = vpop.permute.xlu0 %803  ;;  %v502_v34 = vpop.permute.xlu1 %501 }
 0x1cf   :  { %v909_v35 = vcombine.low %v885_v29, %v901_v31  ;;  %v910_v36 = vcombine.high %v885_v29, %v901_v31  ;;  %v925_v37 = vcombine.low %v892_v30, %v908_v32  ;;  %v926_v38 = vcombine.high %v892_v30, %v908_v32 }
 0x1d0   :  { %v825_v49 = vcombine.low %v792_v25, %v804_v33  ;;  %v826_v50 = vcombine.high %v792_v25, %v804_v33 }
 0x1d1   :  { %v917_v39 = vrot.slane %v909_v35, %v4246_v28  ;;  %v924_v40 = vrot.slane %v910_v36, %v4246_v28  ;;  %v933_v41 = vrot.slane %v925_v37, %v4246_v28  ;;  %v940_v42 = vrot.slane %v926_v38, %v4246_v28 }
 0x1d2   :  { %v508_v43 = vpop.permute.xlu1 %507  ;;  %v500_v44 = vpop.permute.xlu0 %499  ;;  %v833_v62 = vrot.slane %v825_v49, %v4155_v24  ;;  %v840_v63 = vrot.slane %v826_v50, %v4155_v24 }
 0x1d3   :  { %v961_v45 = vcombine.low %v917_v39, %v933_v41  ;;  %v969_v46 = vcombine.low %v924_v40, %v940_v42  ;;  %v3481_v47 = vcombine.high %v917_v39, %v933_v41  ;;  %v3482_v48 = vcombine.high %v924_v40, %v940_v42 }
 0x1d4   :  { %v585_v51 = vcombine.low %v4203_v60, %v508_v43  ;;  %v586_v52 = vcombine.high %v4203_v60, %v508_v43 }
 0x1d5   :  { %v4259_v53 = vrot.slane %v961_v45, %v4155_v24  ;;  %v4262_v54 = vrot.slane %v969_v46, %v4155_v24  ;;  %v4265_v55 = vrot.slane %v3481_v47, %v4155_v24  ;;  %v4268_v56 = vrot.slane %v3482_v48, %v4155_v24 }
 0x1d6   :  { %v798_v57 = vpop.permute.xlu1 %797  ;;  %v506_v58 = vpop.permute.xlu0 %505  ;;  %v593_v3 = vrot.slane %v585_v51, %v4155_v24  ;;  %v600_v4 = vrot.slane %v586_v52, %v4155_v24 }
 0x1d7   :  { %v809_v60 = vcombine.low %v4197_v59, %v798_v57  ;;  %v810_v0 = vcombine.high %v4197_v59, %v798_v57  ;;  %v993_v1 = vcombine.low %v4259_v53, %v4262_v54  ;;  %v1061_v2 = vcombine.low %v4265_v55, %v4268_v56 }
 0x1d8   :  { %v517_v8 = vcombine.low %v4209_v61, %v506_v58  ;;  %v518_v9 = vcombine.high %v4209_v61, %v506_v58 }
 0x1d9   :  { %v817_v5 = vrot.slane %v809_v60, %v4155_v24  ;;  %v824_v6 = vrot.slane %v810_v0, %v4155_v24 }
 0x1da   :  { %v514_v10 = vpop.permute.xlu1 %513  ;;  %v512_v59 = vpop.permute.xlu0 %511  ;;  %v525_v51 = vrot.slane %v517_v8, %v4155_v24  ;;  %v532_v52 = vrot.slane %v518_v9, %v4155_v24 }
 0x1db   :  { %v601_v11 = vcombine.low %v502_v34, %v514_v10  ;;  %v602_v12 = vcombine.high %v502_v34, %v514_v10  ;;  %v533_v13 = vcombine.low %v500_v44, %v512_v59  ;;  %v534_v18 = vcombine.high %v500_v44, %v512_v59 }
 0x1dc   :  { %v841_v15 = vcombine.low %v817_v5, %v833_v62  ;;  %v842_v16 = vcombine.high %v817_v5, %v833_v62  ;;  %v857_v17 = vcombine.low %v824_v6, %v840_v63  ;;  %v858_v19 = vcombine.high %v824_v6, %v840_v63 }
 0x1dd   :  { %v609_v20 = vrot.slane %v601_v11, %v4155_v24  ;;  %v616_v21 = vrot.slane %v602_v12, %v4155_v24  ;;  %v541_v22 = vrot.slane %v533_v13, %v4155_v24  ;;  %v548_v23 = vrot.slane %v534_v18, %v4155_v24 }
 0x1de   :  { %v849_v61 = vrot.slane %v841_v15, %v4246_v28  ;;  %v856_v25 = vrot.slane %v842_v16, %v4246_v28  ;;  %v865_v26 = vrot.slane %v857_v17, %v4246_v28  ;;  %v872_v27 = vrot.slane %v858_v19, %v4246_v28 }
 0x1df   :  { %v617_v29 = vcombine.low %v593_v3, %v609_v20  ;;  %v618_v30 = vcombine.high %v593_v3, %v609_v20  ;;  %v633_v31 = vcombine.low %v600_v4, %v616_v21  ;;  %v634_v32 = vcombine.high %v600_v4, %v616_v21 }
 0x1e0   :  { %v945_v33 = vcombine.low %v849_v61, %v865_v26  ;;  %v953_v34 = vcombine.low %v856_v25, %v872_v27  ;;  %v3479_v35 = vcombine.high %v849_v61, %v865_v26  ;;  %v3480_v36 = vcombine.high %v856_v25, %v872_v27 }
 0x1e1   :  { %v625_v37 = vrot.slane %v617_v29, %v4246_v28  ;;  %v632_v38 = vrot.slane %v618_v30, %v4246_v28  ;;  %v641_v39 = vrot.slane %v633_v31, %v4246_v28  ;;  %v648_v40 = vrot.slane %v634_v32, %v4246_v28 }
 0x1e2   :  { %v4297_v41 = vrot.slane %v945_v33, %v4155_v24  ;;  %v4300_v42 = vrot.slane %v953_v34, %v4155_v24  ;;  %v1020_v43 = vrot.slane %v3479_v35, %v4155_v24  ;;  %v1028_v44 = vrot.slane %v3480_v36, %v4155_v24 }
 0x1e3   :  { %v669_v45 = vcombine.low %v625_v37, %v641_v39  ;;  %v677_v46 = vcombine.low %v632_v38, %v648_v40  ;;  %v3477_v47 = vcombine.high %v625_v37, %v641_v39  ;;  %v3478_v48 = vcombine.high %v632_v38, %v648_v40 }
 0x1e4   :  { %v977_v49 = vcombine.low %v4297_v41, %v4300_v42  ;;  %v1045_v50 = vcombine.low %v1020_v43, %v1028_v44  ;;  %v549_v60 = vcombine.low %v525_v51, %v541_v22  ;;  %v550_v0 = vcombine.high %v525_v51, %v541_v22 }
 0x1e5   :  { %v676_v57 = vrot.slane %v669_v45, %v4155_v24  ;;  %v684_v58 = vrot.slane %v677_v46, %v4155_v24  ;;  %v744_v62 = vrot.slane %v3477_v47, %v4155_v24  ;;  %v752_v63 = vrot.slane %v3478_v48, %v4155_v24 }
 0x1e6   :  { %v565_v3 = vcombine.low %v532_v52, %v548_v23  ;;  %v566_v4 = vcombine.high %v532_v52, %v548_v23  ;;  %v1001_v5 = vrot.slane %v993_v1, %v4246_v28  ;;  %v4314_v6 = vrot.slane %v1061_v2, %v4246_v28 }
 0x1e7   :  { %v557_v8 = vrot.slane %v549_v60, %v4246_v28  ;;  %v564_v9 = vrot.slane %v550_v0, %v4246_v28  ;;  %v701_v11 = vcombine.low %v676_v57, %v684_v58  ;;  %v769_v12 = vcombine.low %v744_v62, %v752_v63  ;;  %v3604_v60 = vpop.f32.mrb[2].mxu0 }
 0x1e8   :  { %v573_v10 = vrot.slane %v565_v3, %v4246_v28  ;;  %v580_v59 = vrot.slane %v566_v4, %v4246_v28  ;;  %v985_v13 = vrot.slane %v977_v49, %v4246_v28  ;;  %v4322_v18 = vrot.slane %v1045_v50, %v4246_v28  ;;  %v488_v0 = vpop.f32.mrb[3].mxu0 }
 0x1e9   :  { %v1046_v17 = vcombine.high %v1020_v43, %v1028_v44  ;;  %v1062_v25 = vcombine.high %v4265_v55, %v4268_v56  ;;  %v770_v26 = vcombine.high %v744_v62, %v752_v63  ;;  %v709_v27 = vrot.slane %v701_v11, %v4246_v28 }
 0x1ea   :  { %v653_v1 = vcombine.low %v557_v8, %v573_v10  ;;  %v661_v15 = vcombine.low %v564_v9, %v580_v59  ;;  %v3475_v16 = vcombine.high %v557_v8, %v573_v10  ;;  %v3476_v2 = vcombine.high %v564_v9, %v580_v59 }
 0x1eb   :  { %v1009_v19 = vcombine.low %v985_v13, %v1001_v5  ;;  %v1077_v20 = vcombine.low %v4322_v18, %v4314_v6  ;;  %v777_v32 = vrot.slane %v769_v12, %v4246_v28  ;;  %v978_v33 = vcombine.high %v4297_v41, %v4300_v42 }
 0x1ec   :  { %v660_v21 = vrot.slane %v653_v1, %v4155_v24  ;;  %v668_v22 = vrot.slane %v661_v15, %v4155_v24  ;;  %v728_v23 = vrot.slane %v3475_v16, %v4155_v24  ;;  %v736_v61 = vrot.slane %v3476_v2, %v4155_v24 }
 0x1ed   :  { %3606 = vmatpush3.xpose.msk.msra.mxu1 %vm1373_vm2, %v1009_v19  ;;  %3626 = vmatpush3.xpose.msk.msra.mxu0 %vm1373_vm2, %v1077_v20  ;;  %v1060_v55 = vrot.slane %v1046_v17, %v4246_v28  ;;  %v994_v35 = vcombine.high %v4259_v53, %v4262_v54  ;;  %v702_v36 = vcombine.high %v676_v57, %v684_v58 }
 0x1ee   :  { %v685_v29 = vcombine.low %v660_v21, %v668_v22  ;;  %v753_v30 = vcombine.low %v728_v23, %v736_v61  ;;  %v754_v31 = vcombine.high %v728_v23, %v736_v61  ;;  %3610 = vmatprep.subr.mxu1 %v3974_v14  ;;  %3635 = vmatprep.subr.mxu0 %v3974_v14 }
 0x1ef   :  { %v1076_v37 = vrot.slane %v1062_v25, %v4246_v28  ;;  %v784_v38 = vrot.slane %v770_v26, %v4246_v28  ;;  %v686_v39 = vcombine.high %v660_v21, %v668_v22  ;;  %v1010_v42 = vcombine.high %v985_v13, %v1001_v5  ;;  %v3472_v26 = vld [vmem:[%s4681_s7] ss:$0 sm:$0xff]  ;;  %s3977_s7 = smov 24  }
 0x1f0   :  { %v693_v56 = vrot.slane %v685_v29, %v4246_v28  ;;  %v761_v34 = vrot.slane %v753_v30, %v4246_v28  ;;  %v768_v41 = vrot.slane %v754_v31, %v4246_v28  ;;  %v992_v45 = vrot.slane %v978_v33, %v4246_v28 }
 0x1f1   :  { %v1079_v44 = vcombine.low %v1060_v55, %v1076_v37  ;;  %v1008_v53 = vrot.slane %v994_v35, %v4246_v28  ;;  %v716_v54 = vrot.slane %v702_v36, %v4246_v28  ;;  %v700_v48 = vrot.slane %v686_v39, %v4246_v28 }
 0x1f2   :  { %v717_v40 = vcombine.low %v693_v56, %v709_v27  ;;  %v785_v43 = vcombine.low %v761_v34, %v777_v32  ;;  %v718_v46 = vcombine.high %v693_v56, %v709_v27  ;;  %v787_v47 = vcombine.low %v768_v41, %v784_v38 }
 0x1f3   :  { %v1011_v49 = vcombine.low %v992_v45, %v1008_v53  ;;  %v719_v50 = vcombine.low %v700_v48, %v716_v54  ;;  %v1012_v51 = vcombine.high %v992_v45, %v1008_v53  ;;  %v720_v52 = vcombine.high %v700_v48, %v716_v54 }
 0x1f4   :  { %3608 = vmatmul.mubr.msk.f32.vlgmr.msra.gmra.mrb[2].mxu1 %vm1373_vm2, %v717_v40  ;;  %3628 = vmatmul.mubr.msk.f32.vlgmr.msra.gmra.mrb[4].mxu0 %vm1373_vm2, %v785_v43  ;;  %v1078_v57 = vcombine.high %v4322_v18, %v4314_v6  ;;  %v786_v58 = vcombine.high %v761_v34, %v777_v32  ;;  %v1080_v62 = vcombine.high %v1060_v55, %v1076_v37 }
 0x1f5   :  { %3611 = vmatpush3.xpose.msk.msra.mxu1 %vm1373_vm2, %v1010_v42  ;;  %3636 = vmatpush3.xpose.msk.msra.mxu0 %vm1373_vm2, %v1079_v44  ;;  %v788_v63 = vcombine.high %v768_v41, %v784_v38  ;;  %v4401_v27 = vadd.f32 %v3472_v26, %v488_v0  ;;  %v4407_v29 = vadd.f32 %v3604_v60, %v3472_v26 }
 0x1f6   :  { %3612 = vmatprep.mubr.msk.f32.mxu1 %vm3975_vm1, %v3974_v14  ;;  %3615 = vmatprep.subr.mxu1 %v3974_v14 }
 0x1f7   :  { %3637 = vmatprep.mubr.msk.f32.mxu0 %vm3975_vm1, %v3974_v14  ;;  %3645 = vmatprep.subr.mxu0 %v3974_v14 }
 0x1f8   :  { %3613 = vmatmul.mubr.msk.f32.vlgmr.msra.gmra.mrb[4].mxu1 %vm1373_vm2, %v718_v46  ;;  %3638 = vmatmul.mubr.msk.f32.vlgmr.msra.gmra.mrb[6].mxu0 %vm1373_vm2, %v787_v47 }
 0x1f9   :  { %3616 = vmatpush3.xpose.msk.msra.mxu1 %vm1373_vm2, %v1011_v49  ;;  %3617 = vmatprep.mubr.msk.f32.mxu1 %vm3975_vm1, %v3974_v14 }
 0x1fa   :  { %3620 = vmatprep.subr.mxu1 %v3974_v14  ;;  %3647 = vmatprep.mubr.msk.f32.mxu0 %vm3975_vm1, %v3974_v14 }
 0x1fc   :  { %3618 = vmatmul.mubr.msk.f32.vlgmr.msra.gmra.mrb[6].mxu1 %vm1373_vm2, %v719_v50 }
 0x1fd   :  { %3621 = vmatpush3.xpose.msk.msra.mxu1 %vm1373_vm2, %v1012_v51  ;;  %3622 = vmatprep.mubr.msk.f32.mxu1 %vm3975_vm1, %v3974_v14 }
 0x1fe   :  { %3630 = vmatprep.subr.mxu1 %v3974_v14 }
 0x200   :  { %3623 = vmatmul.mubr.msk.f32.vlgmr.msra.gmra.mrb[8].mxu1 %vm1373_vm2, %v720_v52 }
 0x201   :  { %3631 = vmatpush3.xpose.msk.msra.mxu1 %vm1373_vm2, %v1078_v57  ;;  %3632 = vmatprep.mubr.msk.f32.mxu1 %vm3975_vm1, %v3974_v14 }
 0x202   :  { %3640 = vmatprep.subr.mxu1 %v3974_v14 }
 0x204   :  { %3633 = vmatmul.mubr.msk.f32.vlgmr.msra.gmra.mrb[10].mxu1 %vm1373_vm2, %v786_v58 }
 0x205   :  { %3641 = vmatpush3.xpose.msk.msra.mxu1 %vm1373_vm2, %v1080_v62  ;;  %3642 = vmatprep.mubr.msk.f32.mxu1 %vm3975_vm1, %v3974_v14 }
 0x206   :  { %3650 = vmatprep.subr.mxu1 %v3974_v14 }
 0x208   :  { %3643 = vmatmul.mubr.msk.f32.vlgmr.msra.gmra.mrb[12].mxu1 %vm1373_vm2, %v788_v63 }
 0x209   :  { %3652 = vmatprep.mubr.msk.f32.mxu1 %vm3975_vm1, %v3974_v14 }
 0x2c7   :  { %v1446_v3 = vpop.f32.mrb[2].mxu1  ;;  %v1750_v4 = vpop.f32.mrb[4].mxu0 }
 0x2c8   :  { %v3609_v5 = vpop.f32.mrb[3].mxu1  ;;  %v3629_v6 = vpop.f32.mrb[5].mxu0  ;;  %v1982_v8 = vsel %vm1373_vm2, %v1446_v3, -inf  ;;  %v1994_v1 = vsel %vm1373_vm2, %v1750_v4, -inf }
 0x2c9   :  { %1983 = vmax.xlane.f32.xlu0 %v1982_v8 }
 0x2cb   :  { %v1522_v9 = vpop.f32.mrb[4].mxu1  ;;  %v1902_v10 = vpop.f32.mrb[6].mxu0 }
 0x2cc   :  { %v3614_v59 = vpop.f32.mrb[5].mxu1  ;;  %v3639_v11 = vpop.f32.mrb[7].mxu0  ;;  %v1985_v12 = vsel %vm1373_vm2, %v1522_v9, -inf  ;;  %v2000_v17 = vsel %vm1373_vm2, %v1902_v10, -inf }
 0x2cd   :  { %1986 = vmax.xlane.f32.xlu1 %v1985_v12 }
 0x2cf   :  { %v1598_v13 = vpop.f32.mrb[6].mxu1 }
 0x2d0   :  { %v3619_v18 = vpop.f32.mrb[7].mxu1  ;;  %v1988_v15 = vsel %vm1373_vm2, %v1598_v13, -inf }
 0x2d1   :  { %1995 = vmax.xlane.f32.xlu1 %v1994_v1  ;;  %1989 = vmax.xlane.f32.xlu0 %v1988_v15 }
 0x2d3   :  { %v1674_v16 = vpop.f32.mrb[8].mxu1 }
 0x2d4   :  { %v3624_v2 = vpop.f32.mrb[9].mxu1  ;;  %v1991_v19 = vsel %vm1373_vm2, %v1674_v16, -inf }
 0x2d5   :  { %2001 = vmax.xlane.f32.xlu1 %v2000_v17  ;;  %1992 = vmax.xlane.f32.xlu0 %v1991_v19 }
 0x2d7   :  { %v1826_v20 = vpop.f32.mrb[10].mxu1 }
 0x2d8   :  { %v3634_v21 = vpop.f32.mrb[11].mxu1  ;;  %v1997_v22 = vsel %vm1373_vm2, %v1826_v20, -inf }
 0x2d9   :  { %1998 = vmax.xlane.f32.xlu0 %v1997_v22 }
 0x2db   :  { %v1978_v23 = vpop.f32.mrb[12].mxu1 }
 0x2dc   :  { %v3644_v61 = vpop.f32.mrb[13].mxu1  ;;  %v2003_v25 = vsel %vm1373_vm2, %v1978_v23, -inf }
 0x2dd   :  { %2004 = vmax.xlane.f32.xlu0 %v2003_v25 }
 0x2e6   :  { %1083 = vrot.lane.b32.xlu1 %v4401_v27, %s3972_s23 }
 0x2ea   :  { %1089 = vrot.lane.b32.xlu1 %v4401_v27, %s3971_s21 }
 0x2ee   :  { %1091 = vrot.lane.b32.xlu1 %v4407_v29, %s3971_s21 }
 0x2f2   :  { %1097 = vrot.lane.b32.xlu1 %v4407_v29, %s3973_s6 }
 0x2f3   :  { %1085 = vrot.lane.b32.xlu0 %v4407_v29, %s3972_s23 }
 0x2f7   :  { %1095 = vrot.lane.b32.xlu0 %v4401_v27, %s3973_s6 }
 0x356   :  { %v1984_v30 = vpop.xlane.xlu0 %1983 }
 0x357   :  { %v2006_v31 = vsub.f32 %v1446_v3, %v1984_v30 }
 0x359   :  { %v2014_v32 = vmul.f32 1.442695, %v2006_v31 }
 0x35a   :  { %v1987_v33 = vpop.xlane.xlu1 %1986 }
 0x35b   :  { %3752 = vpow2.f32 %v2014_v32  ;;  %v2007_v55 = vsub.f32 %v1522_v9, %v1987_v33 }
 0x35d   :  { %v2016_v37 = vmul.f32 1.442695, %v2007_v55 }
 0x35e   :  { %v1996_v56 = vpop.xlane.xlu1 %1995  ;;  %v1990_v34 = vpop.xlane.xlu0 %1989 }
 0x35f   :  { %v2010_v35 = vsub.f32 %v1750_v4, %v1996_v56  ;;  %v2008_v36 = vsub.f32 %v1598_v13, %v1990_v34 }
 0x361   :  { %v2022_v38 = vmul.f32 1.442695, %v2010_v35  ;;  %v2018_v39 = vmul.f32 1.442695, %v2008_v36 }
 0x362   :  { %v2002_v40 = vpop.xlane.xlu1 %2001  ;;  %v1993_v43 = vpop.xlane.xlu0 %1992 }
 0x363   :  { %3754 = vpow2.f32 %v2022_v38  ;;  %v2012_v41 = vsub.f32 %v1902_v10, %v2002_v40  ;;  %v2009_v42 = vsub.f32 %v1674_v16, %v1993_v43 }
 0x364   :  { %3756 = vpow2.f32 %v2018_v39 }
 0x365   :  { %v4417_v44 = vpop.eup %3752  ;;  %3758 = vpow2.f32 %v2016_v37  ;;  %v2026_v45 = vmul.f32 1.442695, %v2012_v41  ;;  %v2020_v53 = vmul.f32 1.442695, %v2009_v42 }
 0x366   :  { %v1084_v54 = vpop.permute.xlu1 %1083  ;;  %v1999_v46 = vpop.xlane.xlu0 %1998  ;;  %v2030_v47 = vsel %vm1373_vm2, %v4417_v44, 0.0 }
 0x367   :  { %v2011_v48 = vsub.f32 %v1826_v20, %v1999_v46  ;;  %2031 = vadd.xlane.f32.xlu1 %v2030_v47  ;;  %3760 = vpow2.f32 %v2026_v45 }
 0x368   :  { %3762 = vpow2.f32 %v2020_v53 }
 0x369   :  { %v2024_v49 = vmul.f32 1.442695, %v2011_v48 }
 0x36a   :  { %v1090_v50 = vpop.permute.xlu1 %1089  ;;  %v2005_v51 = vpop.xlane.xlu0 %2004 }
 0x36b   :  { %3764 = vpow2.f32 %v2024_v49  ;;  %v2013_v52 = vsub.f32 %v1978_v23, %v2005_v51  ;;  %v1101_v5 = vcombine.low %v4401_v27, %v1090_v50  ;;  %v1102_v10 = vcombine.high %v4401_v27, %v1090_v50 }
 0x36d   :  { %v4421_v57 = vpop.eup %3754  ;;  %v2028_v62 = vmul.f32 1.442695, %v2013_v52  ;;  %v1109_v2 = vrot.slane %v1101_v5, %v4155_v24  ;;  %v1116_v25 = vrot.slane %v1102_v10, %v4155_v24 }
 0x36e   :  { %v4423_v58 = vpop.eup %3756  ;;  %v1092_v63 = vpop.permute.xlu1 %1091  ;;  %v2042_v0 = vsel %vm1373_vm2, %v4421_v57, 0.0 }
 0x36f   :  { %v1086_v60 = vpop.permute.xlu0 %1085  ;;  %v4427_v3 = vpop.eup %3758  ;;  %v2036_v4 = vsel %vm1373_vm2, %v4423_v58, 0.0  ;;  %2043 = vadd.xlane.f32.xlu0 %v2042_v0  ;;  %v1169_v6 = vcombine.low %v4407_v29, %v1092_v63  ;;  %v1170_v8 = vcombine.high %v4407_v29, %v1092_v63  ;;  %3766 = vpow2.f32 %v2028_v62 }
 0x370   :  { %2037 = vadd.xlane.f32.xlu1 %v2036_v4  ;;  %v2033_v12 = vsel %vm1373_vm2, %v4427_v3, 0.0 }
 0x371   :  { %v4434_v9 = vpop.eup %3760  ;;  %v1177_v17 = vrot.slane %v1169_v6, %v4155_v24  ;;  %v1184_v19 = vrot.slane %v1170_v8, %v4155_v24 }
 0x372   :  { %v1098_v59 = vpop.permute.xlu1 %1097  ;;  %v4439_v13 = vpop.eup %3762  ;;  %v2048_v29 = vsel %vm1373_vm2, %v4434_v9, 0.0 }
 0x373   :  { %v1096_v11 = vpop.permute.xlu0 %1095  ;;  %v1185_v18 = vcombine.low %v1086_v60, %v1098_v59  ;;  %v1186_v1 = vcombine.high %v1086_v60, %v1098_v59  ;;  %2034 = vadd.xlane.f32.xlu0 %v2033_v12  ;;  %v2039_v27 = vsel %vm1373_vm2, %v4439_v13, 0.0 }
 0x374   :  { %v1117_v15 = vcombine.low %v1084_v54, %v1096_v11  ;;  %v1118_v16 = vcombine.high %v1084_v54, %v1096_v11 }
 0x375   :  { %v4444_v20 = vpop.eup %3764  ;;  %v1193_v21 = vrot.slane %v1185_v18, %v4155_v24  ;;  %v1200_v22 = vrot.slane %v1186_v1, %v4155_v24 }
 0x376   :  { %v1125_v23 = vrot.slane %v1117_v15, %v4155_v24  ;;  %v1132_v61 = vrot.slane %v1118_v16, %v4155_v24  ;;  %v2045_v26 = vsel %vm1373_vm2, %v4444_v20, 0.0 }
 0x377   :  { %v1201_v30 = vcombine.low %v1177_v17, %v1193_v21  ;;  %v1202_v31 = vcombine.high %v1177_v17, %v1193_v21  ;;  %v1217_v32 = vcombine.low %v1184_v19, %v1200_v22  ;;  %v1218_v33 = vcombine.high %v1184_v19, %v1200_v22  ;;  %2046 = vadd.xlane.f32.xlu1 %v2045_v26 }
 0x378   :  { %v1133_v55 = vcombine.low %v1109_v2, %v1125_v23  ;;  %v1134_v56 = vcombine.high %v1109_v2, %v1125_v23  ;;  %v1149_v34 = vcombine.low %v1116_v25, %v1132_v61  ;;  %v1150_v35 = vcombine.high %v1116_v25, %v1132_v61  ;;  %2040 = vadd.xlane.f32.xlu0 %v2039_v27 }
 0x379   :  { %v1209_v36 = vrot.slane %v1201_v30, %v4246_v28  ;;  %v1216_v37 = vrot.slane %v1202_v31, %v4246_v28  ;;  %v1225_v38 = vrot.slane %v1217_v32, %v4246_v28  ;;  %v1232_v39 = vrot.slane %v1218_v33, %v4246_v28  ;;  %v4465_v47 = vpop.eup %3766 }
 0x37a   :  { %v1141_v40 = vrot.slane %v1133_v55, %v4246_v28  ;;  %v1148_v43 = vrot.slane %v1134_v56, %v4246_v28  ;;  %v1157_v41 = vrot.slane %v1149_v34, %v4246_v28  ;;  %v1164_v42 = vrot.slane %v1150_v35, %v4246_v28 }
 0x37b   :  { %v1253_v45 = vcombine.low %v1209_v36, %v1225_v38  ;;  %v1261_v53 = vcombine.low %v1216_v37, %v1232_v39  ;;  %v3485_v54 = vcombine.high %v1209_v36, %v1225_v38  ;;  %v3486_v46 = vcombine.high %v1216_v37, %v1232_v39 }
 0x37c   :  { %v1237_v48 = vcombine.low %v1141_v40, %v1157_v41  ;;  %v1245_v49 = vcombine.low %v1148_v43, %v1164_v42  ;;  %v3483_v50 = vcombine.high %v1141_v40, %v1157_v41  ;;  %v3484_v51 = vcombine.high %v1148_v43, %v1164_v42  ;;  %2049 = vadd.xlane.f32.xlu0 %v2048_v29 }
 0x37d   :  { %v1260_v52 = vrot.slane %v1253_v45, %v4155_v24  ;;  %v1268_v62 = vrot.slane %v1261_v53, %v4155_v24  ;;  %v1328_v63 = vrot.slane %v3485_v54, %v4155_v24  ;;  %v1336_v60 = vrot.slane %v3486_v46, %v4155_v24 }
 0x37e   :  { %v1244_v0 = vrot.slane %v1237_v48, %v4155_v24  ;;  %v1252_v4 = vrot.slane %v1245_v49, %v4155_v24  ;;  %v1312_v5 = vrot.slane %v3483_v50, %v4155_v24  ;;  %v1320_v6 = vrot.slane %v3484_v51, %v4155_v24 }
 0x37f   :  { %v2051_v8 = vsel %vm1373_vm2, %v4465_v47, 0.0  ;;  %v1285_v10 = vcombine.low %v1260_v52, %v1268_v62  ;;  %v1286_v59 = vcombine.high %v1260_v52, %v1268_v62  ;;  %v1353_v11 = vcombine.low %v1328_v63, %v1336_v60 }
 0x380   :  { %2052 = vadd.xlane.f32.xlu0 %v2051_v8  ;;  %v1269_v12 = vcombine.low %v1244_v0, %v1252_v4  ;;  %v1270_v18 = vcombine.high %v1244_v0, %v1252_v4  ;;  %v1337_v1 = vcombine.low %v1312_v5, %v1320_v6  ;;  %v1338_v15 = vcombine.high %v1312_v5, %v1320_v6 }
 0x381   :  { %v1293_v16 = vrot.slane %v1285_v10, %v4246_v28  ;;  %v1300_v2 = vrot.slane %v1286_v59, %v4246_v28  ;;  %v4480_v17 = vrot.slane %v1353_v11, %v4246_v28  ;;  %v1354_v19 = vcombine.high %v1328_v63, %v1336_v60 }
 0x382   :  { %v1277_v21 = vrot.slane %v1269_v12, %v4246_v28  ;;  %v1284_v22 = vrot.slane %v1270_v18, %v4246_v28  ;;  %v1345_v23 = vrot.slane %v1337_v1, %v4246_v28  ;;  %v4486_v61 = vrot.slane %v1338_v15, %v4246_v28 }
 0x383   :  { %v4489_v25 = vrot.slane %v1354_v19, %v4246_v28 }
 0x384   :  { %v1301_v26 = vcombine.low %v1277_v21, %v1293_v16  ;;  %v1302_v27 = vcombine.high %v1277_v21, %v1293_v16  ;;  %v1303_v29 = vcombine.low %v1284_v22, %v1300_v2  ;;  %v1369_v30 = vcombine.low %v1345_v23, %v4480_v17 }
 0x385   :  { %v1304_v31 = vcombine.high %v1284_v22, %v1300_v2  ;;  %v1371_v32 = vcombine.low %v4486_v61, %v4489_v25  ;;  %v1370_v33 = vcombine.high %v1345_v23, %v4480_v17  ;;  %v1372_v55 = vcombine.high %v4486_v61, %v4489_v25 }
 0x386   :  { %3646 = vmatpush3.msra.mxu0 %v1301_v26  ;;  %3651 = vmatpush3.msra.mxu1 %v1302_v27 }
 0x387   :  { %3655 = vmatprep.subr.mxu0 %v3974_v14  ;;  %3660 = vmatprep.subr.mxu1 %v3974_v14 }
 0x3f4   :  { %v2032_v56 = vpop.xlane.xlu1 %2031 }
 0x3f5   :  { %3768 = vrcp.f32 %v2032_v56 }
 0x3fc   :  { %v2044_v34 = vpop.xlane.xlu0 %2043 }
 0x3fd   :  { %v2038_v35 = vpop.xlane.xlu1 %2037 }
 0x3fe   :  { %3770 = vrcp.f32 %v2038_v35 }
 0x3ff   :  { %v3769_v36 = vpop.eup %3768  ;;  %3772 = vrcp.f32 %v2044_v34 }
 0x400   :  { %v2055_v37 = vmul.f32 %v3769_v36, %v4417_v44  ;;  %v2035_v38 = vpop.xlane.xlu0 %2034 }
 0x401   :  { %3774 = vrcp.f32 %v2035_v38 }
 0x402   :  { %3648 = vmatmul.mubr.msk.f32.vlgmr.msra.gmra.mrb[8].mxu0 %vm1373_vm2, %v2055_v37 }
 0x403   :  { %3656 = vmatpush3.msra.mxu0 %v1303_v29  ;;  %3657 = vmatprep.mubr.msk.f32.mxu0 %vm3975_vm1, %v3974_v14 }
 0x404   :  { %3665 = vmatprep.subr.mxu0 %v3974_v14  ;;  %v2047_v39 = vpop.xlane.xlu1 %2046 }
 0x405   :  { %v2041_v40 = vpop.xlane.xlu0 %2040 }
 0x406   :  { %3776 = vrcp.f32 %v2041_v40 }
 0x407   :  { %3778 = vrcp.f32 %v2047_v39 }
 0x408   :  { %v3771_v43 = vpop.eup %3770 }
 0x409   :  { %v2059_v41 = vmul.f32 %v3771_v43, %v4423_v58  ;;  %v2050_v42 = vpop.xlane.xlu0 %2049  ;;  %v3773_v44 = vpop.eup %3772 }
 0x40a   :  { %3780 = vrcp.f32 %v2050_v42  ;;  %v2063_v54 = vmul.f32 %v3773_v44, %v4421_v57 }
 0x40b   :  { %v3775_v45 = vpop.eup %3774  ;;  %3658 = vmatmul.mubr.msk.f32.vlgmr.msra.gmra.mrb[10].mxu0 %vm1373_vm2, %v2059_v41 }
 0x40c   :  { %v2057_v53 = vmul.f32 %v3775_v45, %v4427_v3  ;;  %3666 = vmatpush3.msra.mxu0 %v1369_v30  ;;  %3667 = vmatprep.mubr.msk.f32.mxu0 %vm3975_vm1, %v3974_v14 }
 0x40d   :  { %v2053_v46 = vpop.xlane.xlu0 %2052  ;;  %3675 = vmatprep.subr.mxu0 %v3974_v14 }
 0x40e   :  { %3782 = vrcp.f32 %v2053_v46  ;;  %3653 = vmatmul.mubr.msk.f32.vlgmr.msra.gmra.mrb[14].mxu1 %vm1373_vm2, %v2057_v53 }
 0x40f   :  { %3661 = vmatpush3.msra.mxu1 %v1304_v31  ;;  %3668 = vmatmul.mubr.msk.f32.vlgmr.msra.gmra.mrb[12].mxu0 %vm1373_vm2, %v2063_v54 }
 0x410   :  { %v3777_v58 = vpop.eup %3776  ;;  %3676 = vmatpush3.msra.mxu0 %v1371_v32  ;;  %3662 = vmatprep.mubr.msk.f32.mxu1 %vm3975_vm1, %v3974_v14 }
 0x411   :  { %v2061_v3 = vmul.f32 %v3777_v58, %v4439_v13  ;;  %3670 = vmatprep.subr.mxu1 %v3974_v14  ;;  %3677 = vmatprep.mubr.msk.f32.mxu0 %vm3975_vm1, %v3974_v14  ;;  %v3779_v57 = vpop.eup %3778 }
 0x412   :  { %v2065_v49 = vmul.f32 %v3779_v57, %v4444_v20 }
 0x413   :  { %3663 = vmatmul.mubr.msk.f32.vlgmr.msra.gmra.mrb[16].mxu1 %vm1373_vm2, %v2061_v3 }
 0x414   :  { %v3781_v48 = vpop.eup %3780  ;;  %3671 = vmatpush3.msra.mxu1 %v1370_v33  ;;  %3672 = vmatprep.mubr.msk.f32.mxu1 %vm3975_vm1, %v3974_v14 }
 0x415   :  { %v2067_v50 = vmul.f32 %v3781_v48, %v4434_v9  ;;  %3680 = vmatprep.subr.mxu1 %v3974_v14 }
 0x417   :  { %3673 = vmatmul.mubr.msk.f32.vlgmr.msra.gmra.mrb[18].mxu1 %vm1373_vm2, %v2065_v49  ;;  %3678 = vmatmul.mubr.msk.f32.vlgmr.msra.gmra.mrb[14].mxu0 %vm1373_vm2, %v2067_v50 }
 0x418   :  { %v3783_v13 = vpop.eup %3782  ;;  %3681 = vmatpush3.msra.mxu1 %v1372_v55  ;;  %3682 = vmatprep.mubr.msk.f32.mxu1 %vm3975_vm1, %v3974_v14 }
 0x419   :  { %v2069_v51 = vmul.f32 %v3783_v13, %v4465_v47 }
 0x41b   :  { %3683 = vmatmul.mubr.msk.f32.vlgmr.msra.gmra.mrb[20].mxu1 %vm1373_vm2, %v2069_v51 }
 0x4d5   :  { %v2139_v52 = vpop.f32.mrb[8].mxu0 }
 0x4d6   :  { %v3649_v62 = vpop.f32.mrb[9].mxu0 }
 0x4de   :  { %v2285_v20 = vpop.f32.mrb[10].mxu0 }
 0x4df   :  { %v2654_v63 = vcombine.low %v2139_v52, %v2285_v20  ;;  %v2655_v9 = vcombine.high %v2139_v52, %v2285_v20  ;;  %v3659_v60 = vpop.f32.mrb[11].mxu0 }
 0x4e1   :  { %v2212_v0 = vpop.f32.mrb[14].mxu1  ;;  %v2662_v12 = vrot.slane %v2654_v63, %v4155_v24  ;;  %v2669_v47 = vrot.slane %v2655_v9, %v4155_v24 }
 0x4e2   :  { %v2431_v4 = vpop.f32.mrb[12].mxu0  ;;  %v3654_v5 = vpop.f32.mrb[15].mxu1 }
 0x4e3   :  { %v3669_v6 = vpop.f32.mrb[13].mxu0  ;;  %v2958_v5 = vld [vmem:[#allocation10] sm:$0xff] }
 0x4e4   :  { %v2959_v6 = vld [vmem:[#allocation10 + $0x8] sm:$0xff] }
 0x4e6   :  { %v2358_v8 = vpop.f32.mrb[16].mxu1 }
 0x4e7   :  { %v2670_v10 = vcombine.low %v2212_v0, %v2358_v8  ;;  %v2671_v59 = vcombine.high %v2212_v0, %v2358_v8  ;;  %v3664_v11 = vpop.f32.mrb[17].mxu1 }
 0x4e8   :  { %v3720_v11 = vpack.c.bf16 %v2959_v6, %v2958_v5  ;;  %v3789_v5 = vld [vmem:[#allocation2 + $0xa] sm:$0x3] }
 0x4e9   :  { %v2678_v18 = vrot.slane %v2670_v10, %v4155_v24  ;;  %v2685_v1 = vrot.slane %v2671_v59, %v4155_v24 }
 0x4ea   :  { %v2504_v15 = vpop.f32.mrb[18].mxu1  ;;  %v2577_v16 = vpop.f32.mrb[14].mxu0  ;;  %3721 = vmatprep.subr.bf16.mxu0 %v3720_v11 }
 0x4eb   :  { %v2686_v2 = vcombine.low %v2662_v12, %v2678_v18  ;;  %v2687_v17 = vcombine.high %v2662_v12, %v2678_v18  ;;  %v2702_v19 = vcombine.low %v2669_v47, %v2685_v1  ;;  %v2703_v21 = vcombine.high %v2669_v47, %v2685_v1  ;;  %v3674_v22 = vpop.f32.mrb[19].mxu1  ;;  %v3679_v23 = vpop.f32.mrb[15].mxu0  ;;  %3723 = vmatpush3.bf16.msra.mxu0 %v3720_v11 }
 0x4ec   :  { %v2722_v61 = vcombine.low %v2431_v4, %v2577_v16  ;;  %v2723_v25 = vcombine.high %v2431_v4, %v2577_v16 }
 0x4ed   :  { %v2694_v27 = vrot.slane %v2686_v2, %v4246_v28  ;;  %v2701_v29 = vrot.slane %v2687_v17, %v4246_v28  ;;  %v2710_v30 = vrot.slane %v2702_v19, %v4246_v28  ;;  %v2717_v31 = vrot.slane %v2703_v21, %v4246_v28 }
 0x4ee   :  { %v2650_v26 = vpop.f32.mrb[20].mxu1  ;;  %v2730_v56 = vrot.slane %v2722_v61, %v4155_v24  ;;  %v2737_v34 = vrot.slane %v2723_v25, %v4155_v24 }
 0x4ef   :  { %v3684_v32 = vpop.f32.mrb[21].mxu1  ;;  %v2738_v33 = vcombine.low %v2504_v15, %v2650_v26  ;;  %v2739_v55 = vcombine.high %v2504_v15, %v2650_v26  ;;  %v2718_v37 = vcombine.high %v2694_v27, %v3974_v14  ;;  %v2719_v38 = vcombine.high %v2701_v29, %v3974_v14 }
 0x4f0   :  { %v2720_v39 = vcombine.high %v2710_v30, %v3974_v14  ;;  %v2721_v40 = vcombine.high %v2717_v31, %v3974_v14 }
 0x4f1   :  { %v2746_v35 = vrot.slane %v2738_v33, %v4155_v24  ;;  %v2753_v36 = vrot.slane %v2739_v55, %v4155_v24  ;;  %v2790_v57 = vcombine.low %v2694_v27, %v2718_v37  ;;  %v2806_v48 = vcombine.low %v2701_v29, %v2719_v38  ;;  %v2960_v29 = vld [vmem:[#allocation10 + $0x10] sm:$0xff] }
 0x4f2   :  { %v2858_v58 = vcombine.low %v2710_v30, %v2720_v39  ;;  %v2874_v3 = vcombine.low %v2717_v31, %v2721_v40  ;;  %v2961_v30 = vld [vmem:[#allocation10 + $0x18] sm:$0xff] }
 0x4f3   :  { %v2754_v43 = vcombine.low %v2730_v56, %v2746_v35  ;;  %v2755_v41 = vcombine.high %v2730_v56, %v2746_v35  ;;  %v2770_v42 = vcombine.low %v2737_v34, %v2753_v36  ;;  %v2771_v44 = vcombine.high %v2737_v34, %v2753_v36 }
 0x4f4   :  { %v2865_v9 = vrot.slane %v2858_v58, %v4155_v24  ;;  %v2881_v60 = vrot.slane %v2874_v3, %v4155_v24  ;;  %v2797_v0 = vrot.slane %v2790_v57, %v4155_v24  ;;  %v2813_v4 = vrot.slane %v2806_v48, %v4155_v24  ;;  %v3511_v58 = vld [vmem:[%s4683_s9] ss:$0 sm:$0xff] }
 0x4f5   :  { %v2762_v45 = vrot.slane %v2754_v43, %v4246_v28  ;;  %v2769_v53 = vrot.slane %v2755_v41, %v4246_v28  ;;  %v2778_v54 = vrot.slane %v2770_v42, %v4246_v28  ;;  %v2785_v46 = vrot.slane %v2771_v44, %v4246_v28 }
 0x4f6   :  { %v3724_v37 = vpack.c.bf16 %v2961_v30, %v2960_v29 }
 0x4f7   :  { %v2786_v49 = vcombine.high %v2762_v45, %v3974_v14  ;;  %v2787_v50 = vcombine.high %v2769_v53, %v3974_v14  ;;  %v2788_v13 = vcombine.high %v2778_v54, %v3974_v14  ;;  %v2789_v51 = vcombine.high %v2785_v46, %v3974_v14 }
 0x4f8   :  { %3725 = vmatprep.subr.bf16.mxu0 %v3724_v37 }
 0x4f9   :  { %v2866_v52 = vcombine.low %v2778_v54, %v2788_v13  ;;  %v2882_v62 = vcombine.low %v2785_v46, %v2789_v51  ;;  %v2798_v20 = vcombine.low %v2762_v45, %v2786_v49  ;;  %v2814_v63 = vcombine.low %v2769_v53, %v2787_v50  ;;  %3727 = vmatpush3.bf16.msra.mxu0 %v3724_v37 }
 0x4fa   :  { %v3982_v37 = vmov 1987475062  }
 0x4fb   :  { %v2873_v8 = vrot.slane %v2866_v52, %v4155_v24  ;;  %v2889_v10 = vrot.slane %v2882_v62, %v4155_v24  ;;  %v2805_v14 = vrot.slane %v2798_v20, %v4155_v24  ;;  %v2821_v59 = vrot.slane %v2814_v63, %v4155_v24 }
 0x4fd   :  { %v2890_v12 = vcombine.low %v2865_v9, %v2873_v8  ;;  %v2906_v47 = vcombine.low %v2881_v60, %v2889_v10  ;;  %v2822_v18 = vcombine.low %v2797_v0, %v2805_v14  ;;  %v2838_v1 = vcombine.low %v2813_v4, %v2821_v59 }
 0x4fe   :  { %v2823_v15 = vcombine.high %v2797_v0, %v2805_v14  ;;  %v2839_v16 = vcombine.high %v2813_v4, %v2821_v59  ;;  %v2891_v2 = vcombine.high %v2865_v9, %v2873_v8  ;;  %v2907_v17 = vcombine.high %v2881_v60, %v2889_v10  ;;  %v3788_v0 = vld [vmem:[#allocation2 + $0x8] sm:$0x3]  ;;  %v3790_v10 = vld [vmem:[#allocation2] sm:$0x3]  ;;  %v3791_v59 = vld [vmem:[#allocation2 + $0x2] sm:$0x3] }
 0x4ff   :  { %v2898_v19 = vrot.slane %v2890_v12, %v4246_v28  ;;  %v2914_v21 = vrot.slane %v2906_v47, %v4246_v28  ;;  %v2830_v22 = vrot.slane %v2822_v18, %v4246_v28  ;;  %v2846_v23 = vrot.slane %v2838_v1, %v4246_v28  ;;  %v3792_v12 = vld [vmem:[#allocation2 + $0xc] sm:$0x3]  ;;  %v3793_v18 = vld [vmem:[#allocation2 + $0xe] sm:$0x3] }
 0x500   :  { %v2837_v61 = vrot.slane %v2823_v15, %v4246_v28  ;;  %v2853_v25 = vrot.slane %v2839_v16, %v4246_v28  ;;  %v2905_v26 = vrot.slane %v2891_v2, %v4246_v28  ;;  %v2921_v27 = vrot.slane %v2907_v17, %v4246_v28  ;;  %v3794_v16 = vld [vmem:[#allocation2 + $0x4] sm:$0x3]  ;;  %v3795_v17 = vld [vmem:[#allocation2 + $0x6] sm:$0x3] }
 0x501   :  { %v2923_v31 = vcombine.high %v2898_v19, %v2914_v21  ;;  %v2922_v32 = vcombine.low %v2898_v19, %v2914_v21  ;;  %v2855_v33 = vcombine.high %v2830_v22, %v2846_v23  ;;  %v2854_v55 = vcombine.low %v2830_v22, %v2846_v23 }
 0x502   :  { %v2857_v56 = vcombine.high %v2837_v61, %v2853_v25  ;;  %v2856_v34 = vcombine.low %v2837_v61, %v2853_v25  ;;  %v2924_v35 = vcombine.low %v2905_v26, %v2921_v27  ;;  %v2925_v36 = vcombine.high %v2905_v26, %v2921_v27 }
 0x503   :  { %2930 = vrot.lane.b32.xlu0 %v2923_v31, %s3966_s29  ;;  %2928 = vrot.lane.b32.xlu1 %v2855_v33, %s3966_s29  ;;  %v3979_v33 = vmov 269488144  }
 0x507   :  { %2944 = vrot.lane.b32.xlu0 %v2857_v56, %s3977_s7  ;;  %2936 = vrot.lane.b32.xlu1 %v2856_v34, %s3978_s25  ;;  %v3980_v56 = vmov 842150450  }
 0x508   :  { %v3165_v34 = vunpack.c.l.s4 %v3980_v56 }
 0x50b   :  { %2938 = vrot.lane.b32.xlu1 %v2924_v35, %s3978_s25  ;;  %v3981_v35 = vmov 1414812756  }
 0x50f   :  { %2946 = vrot.lane.b32.xlu1 %v2925_v36, %s3977_s7  ;;  %v3172_v36 = vunpack.c.l.s4 %v3981_v35 }
 0x575   :  { %v2931_v28 = vpop.permute.xlu0 %2930  ;;  %v2929_v38 = vpop.permute.xlu1 %2928 }
 0x576   :  { %v2950_v39 = vsel %vm1373_vm2, %v2854_v55, %v2929_v38  ;;  %v2951_v45 = vsel %vm1373_vm2, %v2922_v32, %v2931_v28  ;;  %v3158_v55 = vunpack.c.l.s4 %v3979_v33  ;;  %v3179_v28 = vunpack.c.l.s4 %v3982_v37  ;;  %v3515_v33 = vld [vmem:[#allocation11] ss:$0 sm:$0xff] }
 0x577   :  { %v3408_v56 = vcombine.high %v3515_v33, %v3515_v33  ;;  %v3415_v37 = vrot.slane %v3515_v33, %v4155_v24 }
 0x578   :  { %v3159_v38 = vunpack.c.0.s8 %v3158_v55 }
 0x579   :  { %v2945_v40 = vpop.permute.xlu0 %2944  ;;  %v2937_v43 = vpop.permute.xlu1 %2936 }
 0x57a   :  { %v2953_v41 = vsel %vm2952_vm3, %v2950_v39, %v2937_v43  ;;  %v3166_v39 = vunpack.c.0.s8 %v3165_v34  ;;  %v3180_v43 = vunpack.c.0.s8 %v3179_v28  ;;  %v3422_v28 = vrot.slane %v3408_v56, %v4155_v24 }
 0x57b   :  { %v2956_v42 = vsel %vm2955_vm4, %v2953_v41, %v2945_v40  ;;  %v3173_v40 = vunpack.c.0.s8 %v3172_v36  ;;  %v4591_v41 = vsub.s32 %v3159_v38, %v4136_v7 }
 0x57c   :  { %3693 = vmatprep.mubr.msk.f32.mxu0 %vm199_vm0, %v2956_v42  ;;  %v4594_v42 = vsub.s32 %v3166_v39, %v4136_v7 }
 0x57d   :  { %v2939_v44 = vpop.permute.xlu1 %2938 }
 0x57e   :  { %v2954_v53 = vsel %vm2952_vm3, %v2951_v45, %v2939_v44  ;;  %v4597_v44 = vsub.s32 %v3173_v40, %v4136_v7  ;;  %v4600_v45 = vsub.s32 %v3180_v43, %v4136_v7 }
 0x581   :  { %v2947_v54 = vpop.permute.xlu1 %2946 }
 0x582   :  { %v2957_v46 = vsel %vm2955_vm4, %v2954_v53, %v2947_v54 }
 0x583   :  { %3694 = vmatmul.mubr.msk.f32.vlgmr.msra.gmra.mrb[16].mxu0 %vm199_vm0, %v2957_v46 }
 0x656   :  { %v3695_v3 = vpop.f32.mrb[16].mxu0 }
 0x657   :  { %v3047_v57 = vadd.f32 %v3695_v3, %v3511_v58  ;;  %v3041_v48 = vpop.f32.mrb[17].mxu0 }
 0x658   :  { %v3042_v49 = vadd.f32 %v3511_v58, %v3041_v48 }
 0x659   :  { %v3069_v50 = vcombine.high %v3047_v57, %v3047_v57  ;;  %v3076_v13 = vrot.slane %v3047_v57, %v4155_v24 }
 0x65a   :  { %v3052_v51 = vcombine.high %v3042_v49, %v3042_v49  ;;  %v3059_v52 = vrot.slane %v3042_v49, %v4155_v24 }
 0x65b   :  { %v3083_v62 = vrot.slane %v3069_v50, %v4155_v24  ;;  %v3084_v20 = vcombine.high %v3076_v13, %v3076_v13  ;;  %v3098_v4 = vadd.f32 %v3788_v0, %v3076_v13 }
 0x65c   :  { %v3066_v63 = vrot.slane %v3052_v51, %v4155_v24  ;;  %v3067_v9 = vcombine.high %v3059_v52, %v3059_v52  ;;  %v3094_v14 = vadd.f32 %v3790_v10, %v3059_v52 }
 0x65d   :  { %v3085_v60 = vcombine.high %v3083_v62, %v3083_v62  ;;  %v3099_v6 = vadd.f32 %v3789_v5, %v3084_v20  ;;  %v3100_v47 = vadd.f32 %v3792_v12, %v3083_v62 }
 0x65e   :  { %v3068_v8 = vcombine.high %v3066_v63, %v3066_v63  ;;  %v3095_v11 = vadd.f32 %v3791_v59, %v3067_v9  ;;  %v3096_v2 = vadd.f32 %v3794_v16, %v3066_v63 }
 0x65f   :  { %v3101_v1 = vadd.f32 %v3793_v18, %v3085_v60  ;;  %v3127_v15 = vcombine.low %v3098_v4, %v3099_v6 }
 0x660   :  { %v3097_v19 = vadd.f32 %v3795_v17, %v3068_v8  ;;  %v3110_v21 = vcombine.low %v3094_v14, %v3095_v11 }
 0x661   :  { %v3128_v22 = vcombine.low %v3100_v47, %v3101_v1  ;;  %v3135_v61 = vrot.slane %v3127_v15, %v4155_v24 }
 0x662   :  { %v3111_v23 = vcombine.low %v3096_v2, %v3097_v19  ;;  %v3118_v26 = vrot.slane %v3110_v21, %v4155_v24 }
 0x663   :  { %v3142_v25 = vrot.slane %v3128_v22, %v4155_v24 }
 0x664   :  { %v3125_v27 = vrot.slane %v3111_v23, %v4155_v24 }
 0x665   :  { %v3143_v29 = vcombine.low %v3135_v61, %v3142_v25 }
 0x666   :  { %v3126_v30 = vcombine.low %v3118_v26, %v3125_v27 }
 0x667   :  { %v3149_v31 = vsel %vm199_vm0, %v3143_v29, 0.0 }
 0x668   :  { %3150 = vadd.xlane.f32.xlu1 %v3149_v31  ;;  %v3146_v32 = vsel %vm199_vm0, %v3126_v30, 0.0  ;;  %v3514_v31 = vld [vmem:[%s4684_s10] ss:$0 sm:$0xff]  ;;  %s3983_s10 = smov [#allocation13]  }
 0x669   :  { %3147 = vadd.xlane.f32.xlu0 %v3146_v32  ;;  %v3373_v55 = vcombine.high %v3514_v31, %v3514_v31  ;;  %v3380_v34 = vrot.slane %v3514_v31, %v4155_v24  ;;  %s3451_s18 = sshll.u32 %s3983_s10, 4  ;;  %s3452_s18 = int_to_ptr.vmem [resolvable:$true] %s3451_s18 }
 0x66a   :  { %s3928_s8 = scalar_lea.vmem %s3452_s18, 256  ;;  %p3933_p7 = scmp.lt.s32.totalorder %s3452_s18, %s3452_s18 }
 0x66b   :  { %v3387_v35 = vrot.slane %v3373_v55, %v4155_v24  ;;  %p3929_p6 = scmp.ne.s32.totalorder %s3452_s18, %s3928_s8  ;;  %p3934_p8 = scmp.lt.s32.totalorder %s3928_s8, %s3928_s8 }
 0x66d   :  { %p3935_p9 = por %p3934_p8, %p3933_p7 }
 0x66f   :  { %p3936_p10 = pnand %p3935_p9, %p3929_p6 }
 0x6f5   :  { %v3151_v53 = vpop.xlane.xlu1 %3150 }
 0x6f6   :  { %v3154_v54 = vmul.f32 0.03125, %v3151_v53  ;;  %v3148_v46 = vpop.xlane.xlu0 %3147  ;;  %v3388_v53 = vcombine.high %v3380_v34, %v3380_v34 }
 0x6f7   :  { %v3153_v58 = vmul.f32 0.03125, %v3148_v46 }
 0x6f8   :  { %v3191_v3 = vrot.slane %v3154_v54, %v4591_v41  ;;  %v3198_v57 = vrot.slane %v3154_v54, %v4594_v42  ;;  %v3205_v48 = vrot.slane %v3154_v54, %v4597_v44  ;;  %v3212_v49 = vrot.slane %v3154_v54, %v4600_v45 }
 0x6f9   :  { %v3163_v50 = vrot.slane %v3153_v58, %v4591_v41  ;;  %v3170_v13 = vrot.slane %v3153_v58, %v4594_v42  ;;  %v3177_v51 = vrot.slane %v3153_v58, %v4597_v44  ;;  %v3184_v7 = vrot.slane %v3153_v58, %v4600_v45 }
 0x6fa   :  { %v4610_v52 = vsub.f32 %v3098_v4, %v3191_v3  ;;  %v4612_v62 = vsub.f32 %v3099_v6, %v3198_v57  ;;  %v4614_v20 = vsub.f32 %v3100_v47, %v3205_v48  ;;  %v4616_v63 = vsub.f32 %v3101_v1, %v3212_v49 }
 0x6fb   :  { %v3221_v9 = vsub.f32 %v3094_v14, %v3163_v50  ;;  %v3222_v60 = vsub.f32 %v3095_v11, %v3170_v13  ;;  %v3223_v0 = vsub.f32 %v3096_v2, %v3177_v51  ;;  %v3224_v5 = vsub.f32 %v3097_v19, %v3184_v7 }
 0x6fc   :  { %v3233_v8 = vmul.f32 %v4610_v52, %v4610_v52  ;;  %v3234_v10 = vmul.f32 %v4612_v62, %v4612_v62  ;;  %v3235_v4 = vmul.f32 %v4614_v20, %v4614_v20  ;;  %v3236_v6 = vmul.f32 %v4616_v63, %v4616_v63 }
 0x6fd   :  { %v3229_v59 = vmul.f32 %v3221_v9, %v3221_v9  ;;  %v3230_v12 = vmul.f32 %v3222_v60, %v3222_v60  ;;  %v3231_v47 = vmul.f32 %v3223_v0, %v3223_v0  ;;  %v3232_v18 = vmul.f32 %v3224_v5, %v3224_v5 }
 0x6fe   :  { %v3262_v14 = vcombine.low %v3233_v8, %v3234_v10  ;;  %v3263_v11 = vcombine.low %v3235_v4, %v3236_v6  ;;  %v3389_v54 = vcombine.high %v3387_v35, %v3387_v35  ;;  %v3423_v49 = vcombine.high %v3415_v37, %v3415_v37 }
 0x6ff   :  { %v3245_v1 = vcombine.low %v3229_v59, %v3230_v12  ;;  %v3246_v15 = vcombine.low %v3231_v47, %v3232_v18  ;;  %v3424_v50 = vcombine.high %v3422_v28, %v3422_v28 }
 0x700   :  { %v3270_v17 = vrot.slane %v3262_v14, %v4155_v24  ;;  %v3277_v19 = vrot.slane %v3263_v11, %v4155_v24 }
 0x701   :  { %v3253_v16 = vrot.slane %v3245_v1, %v4155_v24  ;;  %v3260_v2 = vrot.slane %v3246_v15, %v4155_v24 }
 0x702   :  { %v3278_v23 = vcombine.low %v3270_v17, %v3277_v19 }
 0x703   :  { %v3261_v21 = vcombine.low %v3253_v16, %v3260_v2 }
 0x704   :  { %v3284_v61 = vsel %vm199_vm0, %v3278_v23, 0.0 }
 0x705   :  { %v3281_v22 = vsel %vm199_vm0, %v3261_v21, 0.0 }
 0x706   :  { %3282 = vadd.xlane.f32.xlu0 %v3281_v22 }
 0x70a   :  { %3285 = vadd.xlane.f32.xlu0 %v3284_v61 }
 0x793   :  { %v3283_v25 = vpop.xlane.xlu0 %3282 }
 0x794   :  { %v3287_v26 = vmul.f32 0.03125, %v3283_v25 }
 0x796   :  { %v3289_v27 = vadd.f32 1e-05, %v3287_v26 }
 0x797   :  { %v3286_v29 = vpop.xlane.xlu0 %3285 }
 0x798   :  { %3784 = vrsqrt.f32 %v3289_v27  ;;  %v3288_v30 = vmul.f32 0.03125, %v3286_v29 }
 0x79a   :  { %v3290_v32 = vadd.f32 1e-05, %v3288_v30 }
 0x79c   :  { %3786 = vrsqrt.f32 %v3290_v32 }
 0x7a2   :  { %v3785_v36 = vpop.eup %3784 }
 0x7a3   :  { %v3301_v38 = vrot.slane %v3785_v36, %v4591_v41  ;;  %v3308_v39 = vrot.slane %v3785_v36, %v4594_v42  ;;  %v3315_v40 = vrot.slane %v3785_v36, %v4597_v44  ;;  %v3322_v43 = vrot.slane %v3785_v36, %v4600_v45 }
 0x7a5   :  { %v3359_v46 = vmul.f32 %v3301_v38, %v3221_v9  ;;  %v3360_v58 = vmul.f32 %v3308_v39, %v3222_v60  ;;  %v3361_v3 = vmul.f32 %v3315_v40, %v3223_v0  ;;  %v3362_v57 = vmul.f32 %v3322_v43, %v3224_v5 }
 0x7a6   :  { %v3787_v48 = vpop.eup %3786 }
 0x7a7   :  { %v3329_v24 = vrot.slane %v3787_v48, %v4591_v41  ;;  %v3336_v13 = vrot.slane %v3787_v48, %v4594_v42  ;;  %v3343_v51 = vrot.slane %v3787_v48, %v4597_v44  ;;  %v3350_v7 = vrot.slane %v3787_v48, %v4600_v45 }
 0x7a8   :  { %v3394_v8 = vmul.f32 %v3380_v34, %v3359_v46  ;;  %v3395_v10 = vmul.f32 %v3388_v53, %v3360_v58  ;;  %v3396_v4 = vmul.f32 %v3387_v35, %v3361_v3  ;;  %v3397_v6 = vmul.f32 %v3389_v54, %v3362_v57 }
 0x7a9   :  { %v3363_v9 = vmul.f32 %v3329_v24, %v4610_v52  ;;  %v3364_v60 = vmul.f32 %v3336_v13, %v4612_v62  ;;  %v3365_v0 = vmul.f32 %v3343_v51, %v4614_v20  ;;  %v3366_v5 = vmul.f32 %v3350_v7, %v4616_v63 }
 0x7aa   :  { %v3429_v59 = vadd.f32 %v3415_v37, %v3394_v8  ;;  %v3430_v41 = vadd.f32 %v3423_v49, %v3395_v10  ;;  %v3431_v12 = vadd.f32 %v3422_v28, %v3396_v4  ;;  %v3432_v42 = vadd.f32 %v3424_v50, %v3397_v6 }
 0x7ab   :  { %v3398_v44 = vmul.f32 %v3380_v34, %v3363_v9  ;;  %v3399_v45 = vmul.f32 %v3388_v53, %v3364_v60  ;;  %v3400_v47 = vmul.f32 %v3387_v35, %v3365_v0  ;;  %v3401_v18 = vmul.f32 %v3389_v54, %v3366_v5 }
 0x7ac   :  { %3438 = vst.msk [vmem:[#allocation13] sm:$0x3] %vm3437_vm5, %v3429_v59  ;;  %3439 = vst.msk [vmem:[#allocation13 + $0x2] sm:$0x3] %vm3437_vm5, %v3430_v41 }
 0x7ad   :  { %3440 = vst.msk [vmem:[#allocation13 + $0x4] sm:$0x3] %vm3437_vm5, %v3431_v12  ;;  %3441 = vst.msk [vmem:[#allocation13 + $0x6] sm:$0x3] %vm3437_vm5, %v3432_v42  ;;  %v3433_v52 = vadd.f32 %v3415_v37, %v3398_v44  ;;  %v3434_v62 = vadd.f32 %v3423_v49, %v3399_v45  ;;  %v3435_v20 = vadd.f32 %v3422_v28, %v3400_v47 }
 0x7ae   :  { %v3436_v63 = vadd.f32 %v3424_v50, %v3401_v18 }
 0x7af   :  { %3442 = vst.msk [vmem:[#allocation13 + $0x8] sm:$0x3] %vm3437_vm5, %v3433_v52  ;;  %3443 = vst.msk [vmem:[#allocation13 + $0xa] sm:$0x3] %vm3437_vm5, %v3434_v62 }
 0x7b0   :  { %3444 = vst.msk [vmem:[#allocation13 + $0xc] sm:$0x3] %vm3437_vm5, %v3435_v20  ;;  %3445 = vst.msk [vmem:[#allocation13 + $0xe] sm:$0x3] %vm3437_vm5, %v3436_v63 }
 0x7b1   :  { %3939 = shalt.err (!%p3936_p10)
}
 0x7b2   :  { %s3940_s11 = scalar_lea.hbm %s4686_s12, 256 }
 0x7b3   :  { %p3941_p11 = scmp.ne.s32.totalorder %s4686_s12, %s3940_s11  ;;  %p3944_p12 = scmp.lt.u32.totalorder %s3940_s11, %s4686_s12 }
 0x7b5   :  { %p3946_p13 = pnand %p3944_p12, %p3941_p11 }
 0x7b7   :  { %3949 = shalt.err (!%p3946_p13)
}
 0x7b8   :  { %3457 = dma.vmem_to_hbm [thread:$0]  %s3452_s18, 256, %s4686_s12, [#allocation4], %s3961_s13, %s3961_s13, %s3962_s14  }
 0x7b9   :  { %3958 = dma.done.wait [#allocation4], 256  }
 0x7ba   :  { %3959 = vsyncadd [#allocation4], 4294967040 }
 0x7bb   :  { %3461 = vsyncpa [#allocation3], 1 }
 0x7bc   :  { %3462 = vsyncpa [#allocation6], 1 }
 0x7bd   :  { %3463 = vsyncpa [#allocation9], 1 }
 0x7be   :  { %3464 = vsyncpa [#allocation12], 1 }
 0x7bf   :  { %3465 = vsyncpa [#allocation4], 1 }

</bundles_post_ra>
